<compile_context>
chip_gen: v6e
topology: v6e:2x2x1
jax: 0.10.0
libtpu: 0.0.40
codegen_flags: <defaults>
</compile_context>

<pallas_src>
import functools

import jax
import jax.numpy as jnp
from jax import lax
from jax.experimental import pallas as pl
from jax.experimental.pallas import tpu as pltpu


def _hard_neg_loss_kernel(m_ref, q_ref, out_ref, colmax_ref, diag_ref, *,
                          margin, tile_m):
    i = pl.program_id(0)
    n_tiles = pl.num_programs(0)
    n, d = q_ref.shape

    @pl.when(i == 0)
    def _init():
        out_ref[...] = jnp.zeros_like(out_ref)
        colmax_ref[...] = jnp.full(colmax_ref.shape, -jnp.inf,
                                   dtype=colmax_ref.dtype)

    r0 = pl.multiple_of(i * tile_m, tile_m)

    m_tile = m_ref[...]          # (TILE_M, D), native dtype
    q_all = q_ref[...]           # (N, D), native dtype

    # Score slab (transposed orientation): s[j, l] = <m[r0 + l], q[j]>.
    # Contract the lane dim of both operands -> no q.T relayout; f32 accumulate.
    s = lax.dot_general(q_all, m_tile,
                        dimension_numbers=(((1,), (1,)), ((), ())),
                        preferred_element_type=jnp.float32)      # (N, TILE_M)

    # Diagonal of this tile's rows: diag[r0+l] = <m[r0+l], q[r0+l]>, O(TILE_M*D).
    q_slice = q_ref[pl.ds(r0, tile_m), :]                        # (TILE_M, D)
    prod = m_tile.astype(jnp.float32) * q_slice.astype(jnp.float32)
    diag_col = jnp.sum(prod, axis=1, keepdims=True)              # (TILE_M, 1)
    # Same values in lane (row) orientation via a tiny MXU mat-vec (no transpose).
    diag_row = lax.dot_general(jnp.ones((1, d), jnp.float32), prod,
                               dimension_numbers=(((1,), (1,)), ((), ())),
                               preferred_element_type=jnp.float32)  # (1, TILE_M)

    # Zero the diagonal entries owned by this tile: s[j, l] where j == r0 + l.
    row_idx = lax.broadcasted_iota(jnp.int32, (n, tile_m), 0)
    col_idx = lax.broadcasted_iota(jnp.int32, (n, tile_m), 1)
    s_nd = jnp.where(row_idx == col_idx + r0, 0.0, s)

    # neg_m contribution of this tile (nmax == 1 -> plain max over queries j).
    row_max = jnp.max(s_nd, axis=0, keepdims=True)               # (1, TILE_M)
    out_ref[...] += jnp.sum(jnp.maximum(row_max + (margin - diag_row), 0.0))

    # Running per-query (column) max and this tile's slice of the diagonal.
    colmax_ref[...] = jnp.maximum(colmax_ref[...],
                                  jnp.max(s_nd, axis=1, keepdims=True))  # (N, 1)
    diag_ref[pl.ds(r0, tile_m), :] = diag_col

    @pl.when(i == n_tiles - 1)
    def _finish():
        neg_q = jnp.sum(jnp.maximum(colmax_ref[...] + (margin - diag_ref[...]),
                                    0.0))
        out_ref[...] += neg_q


def hard_negative_contrastive_loss(m, q, label=None, matched=None, *,
                                   nmax=1, margin=0.2, contrast=True,
                                   tile_m=None):
    """m: (N, D); q: (N, 1, D) or (N, D). `label`/`matched` unused (as in torch)."""
    del label, matched
    assert nmax == 1 and contrast, "only nmax=1, contrast=True implemented"
    if q.ndim == 3:
        q = q[:, 0, :]                     # q.squeeze(1)  (glue, plain JAX)
    n, d = m.shape
    assert q.shape == (n, d)

    if tile_m is None:
        # Row-tile over m; q stays resident.  128-aligned tiles match the v5e
        # 4x128^2 MXU; bump to 256/512 on v6e / size for 64 MiB VMEM on v7x.
        tile_m = 128 if (n % 128 == 0 and n > 128) else n
    assert n % tile_m == 0
    n_tiles = n // tile_m

    kernel = functools.partial(_hard_neg_loss_kernel,
                               margin=float(margin), tile_m=tile_m)

    out = pl.pallas_call(
        kernel,
        out_shape=jax.ShapeDtypeStruct((1, 1), jnp.float32),
        grid_spec=pltpu.PrefetchScalarGridSpec(
            num_scalar_prefetch=0,
            grid=(n_tiles,),
            in_specs=[
                pl.BlockSpec((tile_m, d), lambda i: (i, 0)),   # m: streamed row tiles
                pl.BlockSpec((n, d), lambda i: (0, 0)),        # q: resident
            ],
            out_specs=pl.BlockSpec((1, 1), lambda i: (0, 0)),  # scalar loss accumulator
            scratch_shapes=[
                pltpu.VMEM((n, 1), jnp.float32),   # running column (per-query) max
                pltpu.VMEM((n, 1), jnp.float32),   # diagonal, filled tile by tile
            ],
        ),
        compiler_params=pltpu.CompilerParams(
            dimension_semantics=("arbitrary",),    # sequential: carries accumulators
            vmem_limit_bytes=64 * 1024 * 1024,
        ),
    )(m, q)
    return out[0, 0]


def _reference(m, q, nmax=1, margin=0.2):
    # Pure-JAX reference mirroring the PyTorch module.
    q2 = q[:, 0, :] if q.ndim == 3 else q
    scores = jnp.dot(m, q2.T, precision=lax.Precision.HIGHEST)
    diag = jnp.diag(scores)
    scores0 = scores - jnp.diag(diag)
    max_m = jnp.sort(scores0, axis=1)[:, ::-1][:, :nmax]
    max_q = jnp.sort(scores0, axis=0)[::-1, :][:nmax, :]
    neg_q = jnp.sum(jnp.maximum(max_q + (margin - diag)[None, :], 0.0))
    neg_m = jnp.sum(jnp.maximum(max_m + (margin - diag)[:, None], 0.0))
    return neg_m + neg_q


if __name__ == "__main__":
    key = jax.random.PRNGKey(0)
    k1, k2 = jax.random.split(key)
    N, D = 256, 128                        # small, but exercises the 2-tile grid path
    m = jax.random.normal(k1, (N, D), dtype=jnp.float32) * 0.1
    q = jax.random.normal(k2, (N, 1, D), dtype=jnp.float32) * 0.1
    label = jnp.arange(N, dtype=jnp.int32)  # unused, matches torch signature

    loss = hard_negative_contrastive_loss(m, q, label)
    loss = jax.block_until_ready(loss)

    ref = _reference(m, q)
    assert jnp.allclose(loss, ref, rtol=1e-4, atol=1e-3), (loss, ref)
    print("KERNEL_OK")
</pallas_src>

<mosaic_0001>
module attributes {stable_mosaic.version = 11 : i64} {
  func.func @_hard_neg_loss_kernel(%arg0: i32, %arg1: memref<128x128xf32, #tpu.memory_space<vmem>>, %arg2: memref<256x128xf32, #tpu.memory_space<vmem>>, %arg3: memref<1x1xf32, #tpu.memory_space<vmem>>, %arg4: memref<256x1xf32, #tpu.memory_space<vmem>>, %arg5: memref<256x1xf32, #tpu.memory_space<vmem>>) attributes {dimension_semantics = [#tpu.dimension_semantics<arbitrary>], iteration_bounds = array<i64: 2>, scalar_prefetch = 0 : i64, scratch_operands = 2 : i64, tpu.core_type = #tpu.core_type<tc>, window_params = [{transform_indices = @transform_0, window_bounds = array<i64: 128, 128>}, {pipeline_mode = #tpu.pipeline_mode<synchronous>, transform_indices = @transform_1, window_bounds = array<i64: 256, 128>}, {pipeline_mode = #tpu.pipeline_mode<synchronous>, transform_indices = @transform_2, window_bounds = array<i64: 1, 1>}]} {
    %c0_i32 = arith.constant 0 : i32
    %0 = arith.cmpi eq, %arg0, %c0_i32 : i32
    %1 = arith.extui %0 : i1 to i32
    %c0_i32_0 = arith.constant 0 : i32
    %2 = arith.cmpi ne, %1, %c0_i32_0 : i32
    scf.if %2 {
      %cst_24 = arith.constant 0.000000e+00 : f32
      %47 = vector.broadcast %cst_24 : f32 to vector<1x1xf32>
      %c0_25 = arith.constant 0 : index
      %c0_26 = arith.constant 0 : index
      %48 = vector.load %arg3[%c0_25, %c0_26] : memref<1x1xf32, #tpu.memory_space<vmem>>, vector<1x1xf32>
      tpu.vector_store %arg3[%c0_25, %c0_26], %47 {strides = array<i32>} : memref<1x1xf32, #tpu.memory_space<vmem>>, vector<1x1xf32>,
      %cst_27 = arith.constant 0xFF800000 : f32
      %49 = vector.broadcast %cst_27 : f32 to vector<256x1xf32>
      %c0_28 = arith.constant 0 : index
      %c0_29 = arith.constant 0 : index
      %50 = vector.load %arg4[%c0_28, %c0_29] : memref<256x1xf32, #tpu.memory_space<vmem>>, vector<256x1xf32>
      tpu.vector_store %arg4[%c0_28, %c0_29], %49 {strides = array<i32>} : memref<256x1xf32, #tpu.memory_space<vmem>>, vector<256x1xf32>,
    } else {
    }
    %c128_i32 = arith.constant 128 : i32
    %3 = arith.muli %arg0, %c128_i32 : i32
    %4 = tpu.assume_multiple %3, 128 : i32
    %c0 = arith.constant 0 : index
    %c0_1 = arith.constant 0 : index
    %5 = vector.load %arg1[%c0, %c0_1] : memref<128x128xf32, #tpu.memory_space<vmem>>, vector<128x128xf32>
    %c0_2 = arith.constant 0 : index
    %c0_3 = arith.constant 0 : index
    %6 = vector.load %arg2[%c0_2, %c0_3] : memref<256x128xf32, #tpu.memory_space<vmem>>, vector<256x128xf32>
    %cst = arith.constant dense<0.000000e+00> : vector<256x128xf32>
    %7 = tpu.matmul %6, %5, %cst {dimension_numbers = #tpu.dot_dimension_numbers<[1], [1], [0], [0], [0, 0, 1, 0], [], []>} : vector<256x128xf32>, vector<128x128xf32>, vector<256x128xf32> -> vector<256x128xf32>
    %8 = arith.index_cast %4 : i32 to index
    %c0_4 = arith.constant 0 : index
    %9 = vector.load %arg2[%8, %c0_4] : memref<256x128xf32, #tpu.memory_space<vmem>>, vector<128x128xf32>
    %10 = arith.mulf %5, %9 : vector<128x128xf32>
    %cst_5 = arith.constant dense<0.000000e+00> : vector<128xf32>
    %11 = vector.multi_reduction <add>, %10, %cst_5 [1] : vector<128x128xf32> to vector<128xf32>
    %12 = vector.shape_cast %11 : vector<128xf32> to vector<128x1xf32>
    %cst_6 = arith.constant 1.000000e+00 : f32
    %13 = vector.broadcast %cst_6 : f32 to vector<1x128xf32>
    %cst_7 = arith.constant dense<0.000000e+00> : vector<1x128xf32>
    %14 = tpu.matmul %13, %10, %cst_7 {dimension_numbers = #tpu.dot_dimension_numbers<[1], [1], [0], [0], [0, 0, 1, 0], [], []>} : vector<1x128xf32>, vector<128x128xf32>, vector<1x128xf32> -> vector<1x128xf32>
    %15 = tpu.iota {dimensions = array<i32: 0>} : vector<256x128xi32>
    %16 = tpu.iota {dimensions = array<i32: 1>} : vector<256x128xi32>
    %17 = vector.broadcast %4 : i32 to vector<256x128xi32>
    %18 = arith.addi %16, %17 : vector<256x128xi32>
    %19 = arith.cmpi eq, %15, %18 : vector<256x128xi32>
    %cst_8 = arith.constant 0.000000e+00 : f32
    %20 = vector.broadcast %cst_8 : f32 to vector<256x128xf32>
    %21 = arith.select %19, %20, %7 : vector<256x128xi1>, vector<256x128xf32>
    %cst_9 = arith.constant dense<0xFF800000> : vector<128xf32>
    %22 = vector.multi_reduction <maximumf>, %21, %cst_9 [0] : vector<256x128xf32> to vector<128xf32>
    %23 = vector.shape_cast %22 : vector<128xf32> to vector<1x128xf32>
    %c0_10 = arith.constant 0 : index
    %c0_11 = arith.constant 0 : index
    %24 = vector.load %arg3[%c0_10, %c0_11] : memref<1x1xf32, #tpu.memory_space<vmem>>, vector<1x1xf32>
    %cst_12 = arith.constant 2.000000e-01 : f32
    %25 = vector.broadcast %cst_12 : f32 to vector<1x128xf32>
    %26 = arith.subf %25, %14 : vector<1x128xf32>
    %27 = arith.addf %23, %26 : vector<1x128xf32>
    %cst_13 = arith.constant 0.000000e+00 : f32
    %28 = vector.broadcast %cst_13 : f32 to vector<1x128xf32>
    %29 = arith.maximumf %27, %28 : vector<1x128xf32>
    %30 = vector.shape_cast %29 : vector<1x128xf32> to vector<1x1x128xf32>
    %cst_14 = arith.constant dense<0.000000e+00> : vector<1xf32>
    %31 = vector.multi_reduction <add>, %30, %cst_14 [1, 2] : vector<1x1x128xf32> to vector<1xf32>
    %32 = vector.shape_cast %31 : vector<1xf32> to vector<1x1x1xf32>
    %33 = vector.extract %32[0, 0, 0] : f32 from vector<1x1x1xf32>
    %34 = vector.broadcast %33 : f32 to vector<1x1xf32>
    %35 = arith.addf %24, %34 : vector<1x1xf32>
    %c0_15 = arith.constant 0 : index
    %c0_16 = arith.constant 0 : index
    %36 = vector.load %arg3[%c0_15, %c0_16] : memref<1x1xf32, #tpu.memory_space<vmem>>, vector<1x1xf32>
    tpu.vector_store %arg3[%c0_15, %c0_16], %35 {strides = array<i32>} : memref<1x1xf32, #tpu.memory_space<vmem>>, vector<1x1xf32>,
    %c0_17 = arith.constant 0 : index
    %c0_18 = arith.constant 0 : index
    %37 = vector.load %arg4[%c0_17, %c0_18] : memref<256x1xf32, #tpu.memory_space<vmem>>, vector<256x1xf32>
    %cst_19 = arith.constant dense<0xFF800000> : vector<256xf32>
    %38 = vector.multi_reduction <maximumf>, %21, %cst_19 [1] : vector<256x128xf32> to vector<256xf32>
    %39 = vector.shape_cast %38 : vector<256xf32> to vector<256x1xf32>
    %40 = arith.maximumf %37, %39 : vector<256x1xf32>
    %c0_20 = arith.constant 0 : index
    %c0_21 = arith.constant 0 : index
    %41 = vector.load %arg4[%c0_20, %c0_21] : memref<256x1xf32, #tpu.memory_space<vmem>>, vector<256x1xf32>
    tpu.vector_store %arg4[%c0_20, %c0_21], %40 {strides = array<i32>} : memref<256x1xf32, #tpu.memory_space<vmem>>, vector<256x1xf32>,
    %42 = arith.index_cast %4 : i32 to index
    %c0_22 = arith.constant 0 : index
    %43 = vector.load %arg5[%42, %c0_22] : memref<256x1xf32, #tpu.memory_space<vmem>>, vector<128x1xf32>
    tpu.vector_store %arg5[%42, %c0_22], %12 {strides = array<i32>} : memref<256x1xf32, #tpu.memory_space<vmem>>, vector<128x1xf32>,
    %c1_i32 = arith.constant 1 : i32
    %44 = arith.cmpi eq, %arg0, %c1_i32 : i32
    %45 = arith.extui %44 : i1 to i32
    %c0_i32_23 = arith.constant 0 : i32
    %46 = arith.cmpi ne, %45, %c0_i32_23 : i32
    scf.if %46 {
      %c0_24 = arith.constant 0 : index
      %c0_25 = arith.constant 0 : index
      %47 = vector.load %arg4[%c0_24, %c0_25] : memref<256x1xf32, #tpu.memory_space<vmem>>, vector<256x1xf32>
      %c0_26 = arith.constant 0 : index
      %c0_27 = arith.constant 0 : index
      %48 = vector.load %arg5[%c0_26, %c0_27] : memref<256x1xf32, #tpu.memory_space<vmem>>, vector<256x1xf32>
      %cst_28 = arith.constant 2.000000e-01 : f32
      %49 = vector.broadcast %cst_28 : f32 to vector<256x1xf32>
      %50 = arith.subf %49, %48 : vector<256x1xf32>
      %51 = arith.addf %47, %50 : vector<256x1xf32>
      %cst_29 = arith.constant 0.000000e+00 : f32
      %52 = vector.broadcast %cst_29 : f32 to vector<256x1xf32>
      %53 = arith.maximumf %51, %52 : vector<256x1xf32>
      %54 = vector.shape_cast %53 : vector<256x1xf32> to vector<1x256x1xf32>
      %cst_30 = arith.constant dense<0.000000e+00> : vector<1xf32>
      %55 = vector.multi_reduction <add>, %54, %cst_30 [1, 2] : vector<1x256x1xf32> to vector<1xf32>
      %56 = vector.shape_cast %55 : vector<1xf32> to vector<1x1x1xf32>
      %57 = vector.extract %56[0, 0, 0] : f32 from vector<1x1x1xf32>
      %c0_31 = arith.constant 0 : index
      %c0_32 = arith.constant 0 : index
      %58 = vector.load %arg3[%c0_31, %c0_32] : memref<1x1xf32, #tpu.memory_space<vmem>>, vector<1x1xf32>
      %59 = vector.broadcast %57 : f32 to vector<1x1xf32>
      %60 = arith.addf %58, %59 : vector<1x1xf32>
      %c0_33 = arith.constant 0 : index
      %c0_34 = arith.constant 0 : index
      %61 = vector.load %arg3[%c0_33, %c0_34] : memref<1x1xf32, #tpu.memory_space<vmem>>, vector<1x1xf32>
      tpu.vector_store %arg3[%c0_33, %c0_34], %60 {strides = array<i32>} : memref<1x1xf32, #tpu.memory_space<vmem>>, vector<1x1xf32>,
    } else {
    }
    return
  }
  func.func @transform_0(%arg0: i32) -> (i32, i32) {
    %c0_i32 = arith.constant 0 : i32
    %c0_i32_0 = arith.constant 0 : i32
    return %arg0, %c0_i32 : i32, i32
  }
  func.func @transform_1(%arg0: i32) -> (i32, i32) {
    %c0_i32 = arith.constant 0 : i32
    %c0_i32_0 = arith.constant 0 : i32
    %c0_i32_1 = arith.constant 0 : i32
    return %c0_i32, %c0_i32_0 : i32, i32
  }
  func.func @transform_2(%arg0: i32) -> (i32, i32) {
    %c0_i32 = arith.constant 0 : i32
    %c0_i32_0 = arith.constant 0 : i32
    %c0_i32_1 = arith.constant 0 : i32
    return %c0_i32, %c0_i32_0 : i32, i32
  }
}

</mosaic_0001>

<bundles_post_ra>
// kernel: tpu_custom_call.1
= control target key start
LH: loop header
LB: loop body
LE: loop exit
PB: predicated region body
PF: predicated region fallthrough
CT: control target
= control target key end

     0   :  { %7 = vsyncpa [#allocation5], 0  ;;  %s2279_s0 = inlined_call_operand.hbm [shape: f32[256,128], index: 0, kind: input, shape index: {}]   ;;  %s2280_s1 = inlined_call_operand.hbm [shape: f32[256,128], index: 1, kind: input, shape index: {}]   ;;  %s2281_s2 = inlined_call_operand.hbm [shape: f32[1,1], index: 2, kind: output, shape index: {}]  }
   0x1   :  { %9 = vsyncpa [#allocation5 + $0x1], 0 }
   0x2   :  { %10 = vsyncpa [#allocation8], 0 }
   0x3   :  { %11 = vsyncpa [#allocation6], 0  ;;  %s1673_s9 = smov 0   ;;  %s1675_s10 = smov 0  }
   0x4   :  { %s1677_s11 = smov 0   ;;  %s1679_s12 = smov 0  }
   0x5 LB: > { %s1692_s13 = sadd.s32 4294967295, %s1646_s12   ;;  %p37_p0 = scmp.ne.s32.totalorder %s1638_s10, %s1634_s9  ;;  %s1646_s12 = sphi %s1679_s12, %s2297_s12   ;;  %s1642_s11 = sphi %s1677_s11, %s2296_s11   ;;  %s1638_s10 = sphi %s1675_s10, %s2295_s10   ;;  %s1634_s9 = sphi %s1673_s9, %s2294_s9  }
   0x6   : > { %p2282_p1 = scmp.eq.s32.totalorder %s1692_s13, 0  ;;  %p1261_p2 = scmp.ge.s32.totalorder %s1646_s12, 1 }
   0x7   : > { %p90_p3 = scmp.lt.s32.totalorder %s1646_s12, 3  ;;  %s1648_s16 = smov [#allocation7]  }
   0x8   : > { %p1701_p5 = por %p2282_p1, %p37_p0  ;;  %s102_s17 = sshll.u32 %s1648_s16, 4  ;;  %s103_s17 = int_to_ptr.vmem [resolvable:$true] %s102_s17 }
   0x9   : > { %p1705_p6 = pnand %p1261_p2, %p90_p3  ;;  %s1718_s19 = sadd.s32 1, %s1646_s12  }
   0xa   : > { %s2285_s14 = scalar_select %p1701_p5, 1, 0 }
   0xb   : > { %s2286_s15 = scalar_select %p1705_p6, 1, 0 }
   0xc   : > { %p1472_p7 = pneg %p1705_p6  ;;  %s24_s20 = sadd.s32 1, %s1642_s11 }
   0xd   : > { %s21_s21 = ssub.s32 %s1646_s12, %s1718_s19  ;;  %s1537_s22 = scalar_lea.vmem %s103_s17, 4096 }
   0xe   : > { %p1713_p8 = pnand %p1472_p7, %p2282_p1  ;;  %p1538_p10 = scmp.ne.s32.totalorder %s103_s17, %s1537_s22 }
   0xf   : > { %p1545_p13 = scmp.lt.s32.totalorder %s103_s17, %s103_s17  ;;  %p1546_p0 = scmp.lt.s32.totalorder %s1537_s22, %s1537_s22 }
  0x10   : > { %p1528_p9 = pneg %p1713_p8 }
  0x11   : > { %p1547_p2 = por %p1546_p0, %p1545_p13 }
  0x12   : > { %p1540_p11 = pnand %p1538_p10, %p1528_p9 }
  0x14   : > { %p1541_p12 = pneg %p1540_p11 }
  0x16   : > { %p1548_p3 = pnand %p1547_p2, %p1541_p12 }
  0x18   : > { %1551 = shalt.err (!%p1548_p3)
}
  0x19   : > { %s1649_s23 = smov 128   ;;  %s1650_s24 = smov 8  }
  0x1a   : > { %1475 = dma.hbm_to_vmem [thread:$0]  (!%p1713_p8), %s2280_s1, 4096, %s103_s17, [#allocation8], %s1649_s23, %s1649_s23, %s1650_s24  }
  0x1b   : > { %p22_p7 = scmp.eq.s32.totalorder %s21_s21, 0  ;;  %p31_p9 = scmp.ne.s32.totalorder %s1642_s11, %s1638_s10 }
  0x1c   : > { %p32_p10 = scmp.eq.s32.totalorder %s1646_s12, 0  ;;  %p1481_p11 = scmp.lt.s32.totalorder %s1646_s12, 2 }
  0x1d   : > { %s1738_s27 = scalar_select %p22_p7, %s1642_s11, %s24_s20  }
  0x1e   : > { %p33_p12 = por %p32_p10, %p31_p9  ;;  %s116_s28 = sand.u32 1, %s1642_s11  }
  0x1f   : > { %s1264_s29 = sshll.u32 %s116_s28, 7  ;;  %s1277_s30 = sshll.u32 %s1646_s12, 11 }
  0x20   : > { %s1745_s5 = scalar_lea.hbm %s2279_s0, %s1277_s30  ;;  %s120_s6 = scalar_lea.vmem [#allocation4], %s1264_s29 }
  0x21   : > { %s127_s7 = sshll.u32 %s120_s6, 4  ;;  %p1749_p8 = pnand %p1481_p11, %p33_p12  ;;  %s1747_s7 = int_to_ptr.vmem [resolvable:$true] %s127_s7 }
  0x22   : > { %s1753_s9 = scalar_lea.sflag [#allocation5], %s116_s28  ;;  %s1552_s12 = scalar_lea.hbm %s1745_s5, 2048 }
  0x23   : > { %p1553_p13 = scmp.ne.s32.totalorder %s1745_s5, %s1552_s12  ;;  %p1554_p0 = pneg %p1749_p8 }
  0x24   : > { %s1557_s18 = scalar_lea.hbm %s2279_s0, 4096  ;;  %p1558_p7 = scmp.lt.s32.totalorder %s1745_s5, %s2279_s0 }
  0x25   : > { %p1555_p2 = pnand %p1554_p0, %p1553_p13  ;;  %p1559_p9 = scmp.lt.s32.totalorder %s1557_s18, %s1552_s12 }
  0x27   : > { %p1556_p3 = pneg %p1555_p2  ;;  %p1560_p10 = por %p1559_p9, %p1558_p7 }
  0x29   : > { %p1561_p11 = pnand %p1560_p10, %p1556_p3 }
  0x2b   : > { %1564 = shalt.err (!%p1561_p11)
}
  0x2c   : > { %s1565_s22 = scalar_lea.vmem %s1747_s7, 2048  ;;  %s1651_s25 = smov [#allocation4]  }
  0x2d   : > { %p1566_p12 = scmp.ne.s32.totalorder %s1747_s7, %s1565_s22  ;;  %s1570_s26 = sshll.u32 %s1651_s25, 4  ;;  %s1571_s26 = int_to_ptr.vmem [resolvable:$false] %s1570_s26 }
  0x2e   : > { %s1572_s28 = scalar_lea.vmem %s1571_s26, 4096  ;;  %p1573_p2 = scmp.lt.s32.totalorder %s1747_s7, %s1571_s26 }
  0x2f   : > { %p1568_p4 = pnand %p1566_p12, %p1554_p0  ;;  %p1574_p1 = scmp.lt.s32.totalorder %s1572_s28, %s1565_s22 }
  0x31   : > { %p1569_p13 = pneg %p1568_p4  ;;  %p1575_p5 = por %p1574_p1, %p1573_p2 }
  0x33   : > { %p1576_p6 = pnand %p1575_p5, %p1569_p13 }
  0x35   : > { %1579 = shalt.err (!%p1576_p6)
}
  0x36   : > { %1479 = dma.hbm_to_vmem [thread:$0]  (!%p1749_p8), %s1745_s5, 2048, %s1747_s7, %s1753_s9, %s1649_s23, %s1649_s23, %s1650_s24  }
  0x37   : > { %p2289_p4 = scmp.ne.s32.totalorder %s2286_s15, 0 }
  0x38   : > { %s141_s29 = sand.u32 (!%p2289_p4), 1, %s1638_s10   ;;  %p2290_p1 = scmp.ne.s32.totalorder (!%p2289_p4), %s2285_s14, 0 }
  0x39   : > { %139 = sbr.rel (%p2289_p4) target bundleno = 937 (0x3a9), region = 28  ;;  %s1268_s30 = sshll.u32 (!%p2289_p4), %s141_s29, 7 }
  0x3a   : > { %s142_s3 = scalar_lea.sflag (!%p2289_p4), [#allocation5], %s141_s29  ;;  %s1780_s4 = scalar_lea.vmem (!%p2289_p4), [#allocation4], %s1268_s30 }
  0x3e   : > { %1621 = dma.done.wait (%p2290_p1), %s142_s3, 2048  }
  0x3f   : > { %1623 = vsyncadd (%p2290_p1), %s142_s3, 4294965248  ;;  %p2291_p5 = scmp.eq.s32.totalorder %s1692_s13, 0 }
  0x41   : > { %1625 = dma.done.wait (%p2291_p5), [#allocation8], 4096   ;;  %p2292_p6 = pmov %p2291_p5 }
  0x42   : > { %p2293_p8 = scmp.ne.s32.totalorder %s1692_s13, 0 }
  0x43   : > { %1627 = vsyncadd (%p2292_p6), [#allocation8], 4294963200 }
  0x44   : > { %169 = sbr.rel (%p2293_p8) target bundleno = 91 (0x5b), region = 40 }
  0x49   : > { %vm170_vm0 = vcmask 0   ;;  %vm172_vm1 = vcmask 7168   ;;  %v1652_v0 = vmov 0.0   ;;  %v1653_v1 = vmov -inf  }
  0x4a   : > { %171 = vst.msk [vmem:[#allocation9] sm:$0x1] %vm170_vm0, %v1652_v0 }
  0x4b   : > { %173 = vst.msk [vmem:[#allocation2] sm:$0xff] %vm172_vm1, %v1653_v1  ;;  %174 = vst.msk [vmem:[#allocation2 + $0x8] sm:$0xff] %vm172_vm1, %v1653_v1 }
  0x4c   : > { %175 = vst.msk [vmem:[#allocation2 + $0x10] sm:$0xff] %vm172_vm1, %v1653_v1  ;;  %176 = vst.msk [vmem:[#allocation2 + $0x18] sm:$0xff] %vm172_vm1, %v1653_v1 }
  0x4d   : > { %177 = vst.msk [vmem:[#allocation2 + $0x20] sm:$0xff] %vm172_vm1, %v1653_v1  ;;  %178 = vst.msk [vmem:[#allocation2 + $0x28] sm:$0xff] %vm172_vm1, %v1653_v1 }
  0x4e   : > { %179 = vst.msk [vmem:[#allocation2 + $0x30] sm:$0xff] %vm172_vm1, %v1653_v1  ;;  %180 = vst.msk [vmem:[#allocation2 + $0x38] sm:$0xff] %vm172_vm1, %v1653_v1 }
  0x4f   : > { %181 = vst.msk [vmem:[#allocation2 + $0x40] sm:$0xff] %vm172_vm1, %v1653_v1  ;;  %182 = vst.msk [vmem:[#allocation2 + $0x48] sm:$0xff] %vm172_vm1, %v1653_v1 }
  0x50   : > { %183 = vst.msk [vmem:[#allocation2 + $0x50] sm:$0xff] %vm172_vm1, %v1653_v1  ;;  %184 = vst.msk [vmem:[#allocation2 + $0x58] sm:$0xff] %vm172_vm1, %v1653_v1 }
  0x51   : > { %185 = vst.msk [vmem:[#allocation2 + $0x60] sm:$0xff] %vm172_vm1, %v1653_v1  ;;  %186 = vst.msk [vmem:[#allocation2 + $0x68] sm:$0xff] %vm172_vm1, %v1653_v1 }
  0x52   : > { %187 = vst.msk [vmem:[#allocation2 + $0x70] sm:$0xff] %vm172_vm1, %v1653_v1  ;;  %188 = vst.msk [vmem:[#allocation2 + $0x78] sm:$0xff] %vm172_vm1, %v1653_v1 }
  0x53   : > { %189 = vst.msk [vmem:[#allocation2 + $0x80] sm:$0xff] %vm172_vm1, %v1653_v1  ;;  %190 = vst.msk [vmem:[#allocation2 + $0x88] sm:$0xff] %vm172_vm1, %v1653_v1 }
  0x54   : > { %191 = vst.msk [vmem:[#allocation2 + $0x90] sm:$0xff] %vm172_vm1, %v1653_v1  ;;  %192 = vst.msk [vmem:[#allocation2 + $0x98] sm:$0xff] %vm172_vm1, %v1653_v1 }
  0x55   : > { %193 = vst.msk [vmem:[#allocation2 + $0xa0] sm:$0xff] %vm172_vm1, %v1653_v1  ;;  %194 = vst.msk [vmem:[#allocation2 + $0xa8] sm:$0xff] %vm172_vm1, %v1653_v1 }
  0x56   : > { %195 = vst.msk [vmem:[#allocation2 + $0xb0] sm:$0xff] %vm172_vm1, %v1653_v1  ;;  %196 = vst.msk [vmem:[#allocation2 + $0xb8] sm:$0xff] %vm172_vm1, %v1653_v1 }
  0x57   : > { %197 = vst.msk [vmem:[#allocation2 + $0xc0] sm:$0xff] %vm172_vm1, %v1653_v1  ;;  %198 = vst.msk [vmem:[#allocation2 + $0xc8] sm:$0xff] %vm172_vm1, %v1653_v1 }
  0x58   : > { %199 = vst.msk [vmem:[#allocation2 + $0xd0] sm:$0xff] %vm172_vm1, %v1653_v1  ;;  %200 = vst.msk [vmem:[#allocation2 + $0xd8] sm:$0xff] %vm172_vm1, %v1653_v1 }
  0x59   : > { %201 = vst.msk [vmem:[#allocation2 + $0xe0] sm:$0xff] %vm172_vm1, %v1653_v1  ;;  %202 = vst.msk [vmem:[#allocation2 + $0xe8] sm:$0xff] %vm172_vm1, %v1653_v1 }
  0x5a   : > { %203 = vst.msk [vmem:[#allocation2 + $0xf0] sm:$0xff] %vm172_vm1, %v1653_v1  ;;  %204 = vst.msk [vmem:[#allocation2 + $0xf8] sm:$0xff] %vm172_vm1, %v1653_v1 }
  0x5b PF: > { %v221_v2 = vld [vmem:[%s1780_s4 + $0x78] sm:$0xff]  ;;  %v220_v3 = vld [vmem:[%s1780_s4 + $0x70] sm:$0xff]  ;;  %v1654_v4 = vmov 0.0   ;;  %s1828_s14 = sshll.u32 %s1692_s13, 7  ;;  %vm1655_vm2 = vmmov 0   ;;  %v219_v5 = vld [vmem:[%s1780_s4 + $0x68] sm:$0xff] }
  0x5c   : > { %1343 = vmatprep.subr.mxu0 %v221_v2  ;;  %1423 = vmatprep.subr.mxu1 %v1654_v4  ;;  %v222_v6 = vld [vmem:[#allocation7] sm:$0xff]  ;;  %s1834_s15 = scalar_lea.vmem [#allocation7], %s1828_s14  ;;  %v217_v12 = vld [vmem:[%s1780_s4 + $0x58] sm:$0xff]  ;;  %v216_v15 = vld [vmem:[%s1780_s4 + $0x50] sm:$0xff]  ;;  %v1656_v59 = vmov 1.0   ;;  %vm899_vm3 = vcmask 7168  }
  0x5d   : > { %1344 = vmatpush3.xpose.msra.mxu0 %v221_v2  ;;  %1455 = vmatprep.mubr.msk.f32.mxu1 %vm1655_vm2, %v1654_v4  ;;  %v218_v7 = vld [vmem:[%s1780_s4 + $0x60] sm:$0xff]  ;;  %v495_v8 = vld [vmem:[%s1834_s15 + $0x78] sm:$0xff]  ;;  %v494_v10 = vld [vmem:[%s1834_s15 + $0x70] sm:$0xff]  ;;  %s1910_s23 = scalar_lea.vmem [#allocation3], %s1828_s14  ;;  %p1272_p0 = scmp.ne.s32.totalorder %s1692_s13, 1 }
  0x5e   : > { %1345 = vmatprep.subr.mxu0 %v220_v3  ;;  %1375 = vmatprep.mubr.f32.mxu0 %v222_v6  ;;  %v1837_v9 = vmul.f32 %v495_v8, %v221_v2  ;;  %v1841_v11 = vmul.f32 %v494_v10, %v220_v3  ;;  %v493_v13 = vld [vmem:[%s1834_s15 + $0x68] sm:$0xff]  ;;  %v492_v16 = vld [vmem:[%s1834_s15 + $0x60] sm:$0xff]  ;;  %v491_v19 = vld [vmem:[%s1834_s15 + $0x58] sm:$0xff] }
  0x5f   : > { %v1847_v14 = vmul.f32 %v493_v13, %v219_v5  ;;  %v1853_v17 = vmul.f32 %v492_v16, %v218_v7  ;;  %v215_v18 = vld [vmem:[%s1780_s4 + $0x48] sm:$0xff]  ;;  %v1860_v21 = vld [vmem:[%s1780_s4] sm:$0xff]  ;;  %v507_v25 = vmul.f32 %v491_v19, %v217_v12  ;;  %v483_v26 = vld [vmem:[%s1834_s15 + $0x18] sm:$0xff] }
  0x60   : > { %1424 = vmatpush3.xpose.msra.mxu1 %v1837_v9  ;;  %v481_v20 = vld [vmem:[%s1834_s15 + $0x8] sm:$0xff]  ;;  %v480_v22 = vld [vmem:[%s1834_s15] sm:$0xff]  ;;  %v490_v29 = vld [vmem:[%s1834_s15 + $0x50] sm:$0xff] }
  0x61   : > { %1346 = vmatpush3.xpose.msra.mxu0 %v220_v3  ;;  %1425 = vmatprep.subr.mxu1 %v1654_v4  ;;  %v1864_v23 = vld [vmem:[%s1780_s4 + $0x8] sm:$0xff]  ;;  %v1867_v24 = vmul.f32 %v480_v22, %v1860_v21  ;;  %v214_v28 = vld [vmem:[%s1780_s4 + $0x40] sm:$0xff]  ;;  %v482_v30 = vld [vmem:[%s1834_s15 + $0x10] sm:$0xff]  ;;  %v506_v34 = vmul.f32 %v490_v29, %v216_v15 }
  0x62   : > { %1347 = vmatprep.subr.mxu0 %v219_v5  ;;  %v1872_v27 = vmul.f32 %v481_v20, %v1864_v23  ;;  %v209_v31 = vld [vmem:[%s1780_s4 + $0x18] sm:$0xff]  ;;  %v208_v32 = vld [vmem:[%s1780_s4 + $0x10] sm:$0xff]  ;;  %v485_v35 = vld [vmem:[%s1834_s15 + $0x28] sm:$0xff] }
  0x63   : > { %512 = vadd.xlane.f32.xlu0 %v1867_v24  ;;  %v499_v33 = vmul.f32 %v483_v26, %v209_v31  ;;  %v498_v36 = vmul.f32 %v482_v30, %v208_v32  ;;  %v213_v37 = vld [vmem:[%s1780_s4 + $0x38] sm:$0xff]  ;;  %v489_v38 = vld [vmem:[%s1834_s15 + $0x48] sm:$0xff]  ;;  %v484_v39 = vld [vmem:[%s1834_s15 + $0x20] sm:$0xff]  ;;  %v649_v30 = vstv %s1828_s14 }
  0x64   : > { %1426 = vmatpush3.xpose.msra.mxu1 %v1841_v11  ;;  %514 = vadd.xlane.f32.xlu1 %v1872_v27  ;;  %v211_v40 = vld [vmem:[%s1780_s4 + $0x28] sm:$0xff]  ;;  %v210_v41 = vld [vmem:[%s1780_s4 + $0x20] sm:$0xff]  ;;  %v505_v43 = vmul.f32 %v489_v38, %v215_v18  ;;  %v487_v44 = vld [vmem:[%s1834_s15 + $0x38] sm:$0xff] }
  0x65   : > { %1348 = vmatpush3.xpose.msra.mxu0 %v219_v5  ;;  %1427 = vmatprep.subr.mxu1 %v1654_v4  ;;  %v501_v42 = vmul.f32 %v485_v35, %v211_v40  ;;  %v500_v45 = vmul.f32 %v484_v39, %v210_v41  ;;  %v212_v46 = vld [vmem:[%s1780_s4 + $0x30] sm:$0xff]  ;;  %v488_v47 = vld [vmem:[%s1834_s15 + $0x40] sm:$0xff]  ;;  %v503_v49 = vmul.f32 %v487_v44, %v213_v37  ;;  %v223_v52 = vld [vmem:[#allocation7 + $0x8] sm:$0xff] }
  0x66   : > { %1349 = vmatprep.subr.mxu0 %v218_v7  ;;  %v486_v48 = vld [vmem:[%s1834_s15 + $0x30] sm:$0xff]  ;;  %v504_v50 = vmul.f32 %v488_v47, %v214_v28  ;;  %v225_v54 = vld [vmem:[#allocation7 + $0x18] sm:$0xff]  ;;  %v226_v55 = vld [vmem:[#allocation7 + $0x20] sm:$0xff] }
  0x67   : > { %518 = vadd.xlane.f32.xlu0 %v499_v33  ;;  %v502_v51 = vmul.f32 %v486_v48, %v212_v46  ;;  %v224_v53 = vld [vmem:[#allocation7 + $0x10] sm:$0xff]  ;;  %v227_v56 = vld [vmem:[#allocation7 + $0x28] sm:$0xff]  ;;  %v229_v58 = vld [vmem:[#allocation7 + $0x38] sm:$0xff] }
  0x68   : > { %1428 = vmatpush3.xpose.msra.mxu1 %v1847_v14  ;;  %516 = vadd.xlane.f32.xlu1 %v498_v36  ;;  %v228_v57 = vld [vmem:[#allocation7 + $0x30] sm:$0xff]  ;;  %v230_v60 = vld [vmem:[#allocation7 + $0x40] sm:$0xff]  ;;  %v231_v61 = vld [vmem:[#allocation7 + $0x48] sm:$0xff] }
  0x69   : > { %1350 = vmatpush3.xpose.msra.mxu0 %v218_v7  ;;  %1429 = vmatprep.subr.mxu1 %v1654_v4  ;;  %v232_v62 = vld [vmem:[#allocation7 + $0x50] sm:$0xff]  ;;  %v233_v63 = vld [vmem:[#allocation7 + $0x58] sm:$0xff]  ;;  %v234_v0 = vld [vmem:[#allocation7 + $0x60] sm:$0xff] }
  0x6a   : > { %1351 = vmatprep.subr.mxu0 %v217_v12  ;;  %v235_v1 = vld [vmem:[#allocation7 + $0x68] sm:$0xff]  ;;  %v236_v2 = vld [vmem:[#allocation7 + $0x70] sm:$0xff]  ;;  %v237_v3 = vld [vmem:[#allocation7 + $0x78] sm:$0xff] }
  0x6b   : > { %522 = vadd.xlane.f32.xlu0 %v501_v42  ;;  %v239_v5 = vld [vmem:[#allocation7 + $0x88] sm:$0xff]  ;;  %v240_v6 = vld [vmem:[#allocation7 + $0x90] sm:$0xff]  ;;  %v241_v7 = vld [vmem:[#allocation7 + $0x98] sm:$0xff] }
  0x6c   : > { %1430 = vmatpush3.xpose.msra.mxu1 %v1853_v17  ;;  %520 = vadd.xlane.f32.xlu1 %v500_v45  ;;  %v242_v8 = vld [vmem:[#allocation7 + $0xa0] sm:$0xff]  ;;  %v243_v10 = vld [vmem:[#allocation7 + $0xa8] sm:$0xff]  ;;  %v245_v13 = vld [vmem:[#allocation7 + $0xb8] sm:$0xff] }
  0x6d   : > { %1352 = vmatpush3.xpose.msra.mxu0 %v217_v12  ;;  %1431 = vmatprep.subr.mxu1 %v1654_v4  ;;  %v244_v12 = vld [vmem:[#allocation7 + $0xb0] sm:$0xff]  ;;  %v247_v16 = vld [vmem:[#allocation7 + $0xc8] sm:$0xff]  ;;  %v249_v19 = vld [vmem:[#allocation7 + $0xd8] sm:$0xff] }
  0x6e   : > { %1353 = vmatprep.subr.mxu0 %v216_v15  ;;  %v250_v20 = vld [vmem:[#allocation7 + $0xe0] sm:$0xff]  ;;  %v252_v22 = vld [vmem:[#allocation7 + $0xf0] sm:$0xff] }
  0x6f   : > { %526 = vadd.xlane.f32.xlu0 %v503_v49 }
  0x70   : > { %1432 = vmatpush3.xpose.msra.mxu1 %v507_v25  ;;  %524 = vadd.xlane.f32.xlu1 %v502_v51 }
  0x71   : > { %1354 = vmatpush3.xpose.msra.mxu0 %v216_v15  ;;  %1433 = vmatprep.subr.mxu1 %v1654_v4  ;;  %v246_v15 = vld [vmem:[#allocation7 + $0xc0] sm:$0xff] }
  0x72   : > { %1355 = vmatprep.subr.mxu0 %v215_v18 }
  0x73   : > { %530 = vadd.xlane.f32.xlu0 %v505_v43 }
  0x74   : > { %1434 = vmatpush3.xpose.msra.mxu1 %v506_v34  ;;  %528 = vadd.xlane.f32.xlu1 %v504_v50 }
  0x75   : > { %1356 = vmatpush3.xpose.msra.mxu0 %v215_v18  ;;  %1435 = vmatprep.subr.mxu1 %v1654_v4  ;;  %v248_v18 = vld [vmem:[#allocation7 + $0xd0] sm:$0xff] }
  0x76   : > { %1357 = vmatprep.subr.mxu0 %v214_v28 }
  0x77   : > { %534 = vadd.xlane.f32.xlu0 %v507_v25  ;;  %v614_v25 = vlaneseq }
  0x78   : > { %1436 = vmatpush3.xpose.msra.mxu1 %v505_v43  ;;  %532 = vadd.xlane.f32.xlu1 %v506_v34 }
  0x79   : > { %1358 = vmatpush3.xpose.msra.mxu0 %v214_v28  ;;  %1437 = vmatprep.subr.mxu1 %v1654_v4  ;;  %v648_v28 = vand.u32 127, %v614_v25  ;;  %v1918_v29 = vshrl.u32 %v614_v25, 7 }
  0x7a   : > { %1359 = vmatprep.subr.mxu0 %v213_v37 }
  0x7b   : > { %v616_v34 = vadd.s32 8, %v1918_v29  ;;  %v619_v47 = vadd.s32 32, %v1918_v29 }
  0x7c   : > { %1438 = vmatpush3.xpose.msra.mxu1 %v504_v50 }
  0x7d   : > { %1360 = vmatpush3.xpose.msra.mxu0 %v213_v37  ;;  %1439 = vmatprep.subr.mxu1 %v1654_v4 }
  0x7e   : > { %1361 = vmatprep.subr.mxu0 %v212_v46 }
  0x80   : > { %1440 = vmatpush3.xpose.msra.mxu1 %v503_v49 }
  0x81   : > { %1362 = vmatpush3.xpose.msra.mxu0 %v212_v46  ;;  %1441 = vmatprep.subr.mxu1 %v1654_v4 }
  0x82   : > { %1363 = vmatprep.subr.mxu0 %v211_v40 }
  0x84   : > { %1442 = vmatpush3.xpose.msra.mxu1 %v502_v51 }
  0x85   : > { %1364 = vmatpush3.xpose.msra.mxu0 %v211_v40  ;;  %1443 = vmatprep.subr.mxu1 %v1654_v4  ;;  %v617_v40 = vadd.s32 16, %v1918_v29 }
  0x86   : > { %1365 = vmatprep.subr.mxu0 %v210_v41 }
  0x88   : > { %1444 = vmatpush3.xpose.msra.mxu1 %v501_v42 }
  0x89   : > { %1366 = vmatpush3.xpose.msra.mxu0 %v210_v41  ;;  %1445 = vmatprep.subr.mxu1 %v1654_v4 }
  0x8a   : > { %1367 = vmatprep.subr.mxu0 %v209_v31 }
  0x8c   : > { %1446 = vmatpush3.xpose.msra.mxu1 %v500_v45 }
  0x8d   : > { %1368 = vmatpush3.xpose.msra.mxu0 %v209_v31  ;;  %1447 = vmatprep.subr.mxu1 %v1654_v4 }
  0x8e   : > { %1369 = vmatprep.subr.mxu0 %v208_v32 }
  0x90   : > { %1448 = vmatpush3.xpose.msra.mxu1 %v499_v33  ;;  %v1925_v33 = vadd.s32 %v649_v30, %v648_v28  ;;  %v620_v28 = vadd.s32 40, %v1918_v29  ;;  %v622_v30 = vadd.s32 56, %v1918_v29 }
  0x91   : > { %1370 = vmatpush3.xpose.msra.mxu0 %v208_v32  ;;  %1449 = vmatprep.subr.mxu1 %v1654_v4 }
  0x92   : > { %1371 = vmatprep.subr.mxu0 %v1864_v23  ;;  %vm652_vm4 = vcmp.eq.s32.totalorder %v616_v34, %v1925_v33  ;;  %vm651_vm5 = vcmp.eq.s32.totalorder %v1918_v29, %v1925_v33  ;;  %vm653_vm6 = vcmp.eq.s32.totalorder %v617_v40, %v1925_v33  ;;  %vm655_vm7 = vcmp.eq.s32.totalorder %v619_v47, %v1925_v33 }
  0x93   : > { %v628_v34 = vadd.s32 104, %v1918_v29  ;;  %v2033_v40 = vadd.s32 168, %v1918_v29  ;;  %vm656_vm2 = vcmp.eq.s32.totalorder %v620_v28, %v1925_v33  ;;  %v2047_v47 = vadd.s32 200, %v1918_v29 }
  0x94   : > { %1450 = vmatpush3.xpose.msra.mxu1 %v498_v36 }
  0x95   : > { %1372 = vmatpush3.xpose.msra.mxu0 %v1864_v23  ;;  %1451 = vmatprep.subr.mxu1 %v1654_v4  ;;  %v253_v23 = vld [vmem:[#allocation7 + $0xf8] sm:$0xff] }
  0x96   : > { %1373 = vmatprep.subr.mxu0 %v1860_v21 }
  0x98   : > { %1452 = vmatpush3.xpose.msra.mxu1 %v1872_v27 }
  0x99   : > { %1374 = vmatpush3.xpose.msra.mxu0 %v1860_v21  ;;  %1453 = vmatprep.subr.mxu1 %v1654_v4  ;;  %v238_v4 = vld [vmem:[#allocation7 + $0x80] sm:$0xff]  ;;  %v251_v21 = vld [vmem:[#allocation7 + $0xe8] sm:$0xff] }
  0x9c   : > { %1376 = vmatmul.mubr.f32.vlgmr.msra.gmra.mxu0 %v223_v52  ;;  %1454 = vmatpush3.xpose.msra.mxu1 %v1867_v24  ;;  %v621_v52 = vadd.s32 48, %v1918_v29 }
  0x9d   : > { %1378 = vmatprep.mubr.f32.mxu0 %v224_v53 }
  0x9e   : > { %vm657_vm8 = vcmp.eq.s32.totalorder %v621_v52, %v1925_v33  ;;  %v641_v52 = vadd.s32 208, %v1918_v29 }
  0x9f   : > { %1456 = vmatmul.mubr.f32.vlgmr.msra.gmra.mxu1 %v1656_v59 }
  0xa0   : > { %1379 = vmatmul.mubr.f32.gmra.mxu0 %v225_v54 }
  0xa1   : > { %1381 = vmatprep.mubr.f32.mxu0 %v226_v55 }
  0xa4   : > { %1382 = vmatmul.mubr.f32.gmra.mxu0 %v227_v56 }
  0xa5   : > { %1384 = vmatprep.mubr.f32.mxu0 %v228_v57 }
  0xa8   : > { %1385 = vmatmul.mubr.f32.gmra.mxu0 %v229_v58  ;;  %v623_v58 = vadd.s32 64, %v1918_v29 }
  0xa9   : > { %1387 = vmatprep.mubr.f32.mxu0 %v230_v60 }
  0xaa   : > { %vm659_vm9 = vcmp.eq.s32.totalorder %v623_v58, %v1925_v33 }
  0xac   : > { %1388 = vmatmul.mubr.f32.gmra.mxu0 %v231_v61 }
  0xad   : > { %1390 = vmatprep.mubr.f32.mxu0 %v232_v62  ;;  %v625_v62 = vadd.s32 80, %v1918_v29 }
  0xaf   : > { %vm661_vm10 = vcmp.eq.s32.totalorder %v625_v62, %v1925_v33  ;;  %v643_v62 = vadd.s32 224, %v1918_v29 }
  0xb0   : > { %1391 = vmatmul.mubr.f32.gmra.mxu0 %v233_v63 }
  0xb1   : > { %1393 = vmatprep.mubr.f32.mxu0 %v234_v0 }
  0xb4   : > { %1394 = vmatmul.mubr.f32.gmra.mxu0 %v235_v1 }
  0xb5   : > { %1396 = vmatprep.mubr.f32.mxu0 %v236_v2  ;;  %v627_v2 = vadd.s32 96, %v1918_v29 }
  0xb7   : > { %vm663_vm11 = vcmp.eq.s32.totalorder %v627_v2, %v1925_v33 }
  0xb8   : > { %1397 = vmatmul.mubr.f32.gmra.mxu0 %v237_v3 }
  0xb9   : > { %1399 = vmatprep.mubr.f32.mxu0 %v238_v4 }
  0xbc   : > { %1400 = vmatmul.mubr.f32.gmra.mxu0 %v239_v5 }
  0xbd   : > { %1402 = vmatprep.mubr.f32.mxu0 %v240_v6  ;;  %v629_v6 = vadd.s32 112, %v1918_v29 }
  0xbf   : > { %vm665_vm12 = vcmp.eq.s32.totalorder %v629_v6, %v1925_v33 }
  0xc0   : > { %1403 = vmatmul.mubr.f32.gmra.mxu0 %v241_v7 }
  0xc1   : > { %1405 = vmatprep.mubr.f32.mxu0 %v242_v8 }
  0xc4   : > { %1406 = vmatmul.mubr.f32.gmra.mxu0 %v243_v10 }
  0xc5   : > { %1408 = vmatprep.mubr.f32.mxu0 %v244_v12  ;;  %v631_v12 = vadd.s32 128, %v1918_v29 }
  0xc7   : > { %vm667_vm13 = vcmp.eq.s32.totalorder %v631_v12, %v1925_v33 }
  0xc8   : > { %1409 = vmatmul.mubr.f32.gmra.mxu0 %v245_v13 }
  0xc9   : > { %1411 = vmatprep.mubr.f32.mxu0 %v246_v15 }
  0xcc   : > { %1412 = vmatmul.mubr.f32.gmra.mxu0 %v247_v16 }
  0xcd   : > { %1414 = vmatprep.mubr.f32.mxu0 %v248_v18  ;;  %v633_v18 = vadd.s32 144, %v1918_v29 }
  0xcf   : > { %vm669_vm14 = vcmp.eq.s32.totalorder %v633_v18, %v1925_v33 }
  0xd0   : > { %1415 = vmatmul.mubr.f32.gmra.mxu0 %v249_v19 }
  0xd1   : > { %1417 = vmatprep.mubr.f32.mxu0 %v250_v20 }
  0xd4   : > { %1418 = vmatmul.mubr.f32.gmra.mxu0 %v251_v21 }
  0xd5   : > { %1420 = vmatprep.mubr.f32.mxu0 %v252_v22  ;;  %v635_v22 = vadd.s32 160, %v1918_v29 }
  0xd7   : > { %vm671_vm15 = vcmp.eq.s32.totalorder %v635_v22, %v1925_v33 }
  0xd8   : > { %1421 = vmatmul.mubr.f32.gmra.mxu0 %v253_v23 }
  0xec   : > { %v513_v24 = vpop.xlane.xlu0 %512 }
  0xed   : > { %933 = vst.msk [vmem:[%s1910_s23] sm:$0xff] %vm899_vm3, %v513_v24  ;;  %v515_v26 = vpop.xlane.xlu1 %514 }
  0xee   : > { %934 = vst.msk [vmem:[%s1910_s23 + $0x8] sm:$0xff] %vm899_vm3, %v515_v26  ;;  %v637_v26 = vadd.s32 176, %v1918_v29 }
  0xf0   : > { %v519_v27 = vpop.xlane.xlu0 %518  ;;  %vm673_vm0 = vcmp.eq.s32.totalorder %v637_v26, %v1925_v33 }
  0xf1   : > { %936 = vst.msk [vmem:[%s1910_s23 + $0x18] sm:$0xff] %vm899_vm3, %v519_v27  ;;  %v517_v31 = vpop.xlane.xlu1 %516  ;;  %v618_v27 = vadd.s32 24, %v1918_v29 }
  0xf2   : > { %935 = vst.msk [vmem:[%s1910_s23 + $0x10] sm:$0xff] %vm899_vm3, %v517_v31  ;;  %v624_v31 = vadd.s32 72, %v1918_v29 }
  0xf3   : > { %vm654_vm1 = vcmp.eq.s32.totalorder %v618_v27, %v1925_v33 }
  0xf4   : > { %v523_v32 = vpop.xlane.xlu0 %522 }
  0xf5   : > { %938 = vst.msk [vmem:[%s1910_s23 + $0x28] sm:$0xff] %vm899_vm3, %v523_v32  ;;  %v521_v35 = vpop.xlane.xlu1 %520  ;;  %v626_v32 = vadd.s32 88, %v1918_v29 }
  0xf6   : > { %937 = vst.msk [vmem:[%s1910_s23 + $0x20] sm:$0xff] %vm899_vm3, %v521_v35 }
  0xf8   : > { %v527_v36 = vpop.xlane.xlu0 %526 }
  0xf9   : > { %940 = vst.msk [vmem:[%s1910_s23 + $0x38] sm:$0xff] %vm899_vm3, %v527_v36  ;;  %v525_v37 = vpop.xlane.xlu1 %524  ;;  %v630_v36 = vadd.s32 120, %v1918_v29 }
  0xfa   : > { %939 = vst.msk [vmem:[%s1910_s23 + $0x30] sm:$0xff] %vm899_vm3, %v525_v37  ;;  %v632_v37 = vadd.s32 136, %v1918_v29 }
  0xfc   : > { %v531_v38 = vpop.xlane.xlu0 %530 }
  0xfd   : > { %942 = vst.msk [vmem:[%s1910_s23 + $0x48] sm:$0xff] %vm899_vm3, %v531_v38  ;;  %v529_v44 = vpop.xlane.xlu1 %528  ;;  %v634_v38 = vadd.s32 152, %v1918_v29 }
  0xfe   : > { %941 = vst.msk [vmem:[%s1910_s23 + $0x40] sm:$0xff] %vm899_vm3, %v529_v44  ;;  %v2038_v44 = vadd.s32 184, %v1918_v29 }
 0x100   : > { %v535_v45 = vpop.xlane.xlu0 %534 }
 0x101   : > { %944 = vst.msk [vmem:[%s1910_s23 + $0x58] sm:$0xff] %vm899_vm3, %v535_v45  ;;  %v533_v50 = vpop.xlane.xlu1 %532  ;;  %v639_v45 = vadd.s32 192, %v1918_v29 }
 0x102   : > { %943 = vst.msk [vmem:[%s1910_s23 + $0x50] sm:$0xff] %vm899_vm3, %v533_v50  ;;  %v642_v50 = vadd.s32 216, %v1918_v29 }
 0x15c   : > { %v1377_v39 = vpop.f32.mrf.mxu0 }
 0x15d   : > { %v1940_v41 = vsel %vm652_vm4, 0.0, %v1377_v39  ;;  %vm658_vm4 = vcmp.eq.s32.totalorder %v622_v30, %v1925_v33 }
 0x15e   : > { %v320_v42 = vpop.f32.mrf.mxu0  ;;  %805 = vmax.xlane.f32.xlu0 %v1940_v41 }
 0x15f   : > { %v1943_v43 = vsel %vm651_vm5, 0.0, %v320_v42  ;;  %v1963_v53 = vpop.f32.mrf.mxu1  ;;  %vm660_vm5 = vcmp.eq.s32.totalorder %v624_v31, %v1925_v33 }
 0x160   : > { %v1945_v46 = vpop.f32.mrf.mxu0  ;;  %803 = vmax.xlane.f32.xlu1 %v1943_v43 }
 0x161   : > { %v1457_v56 = vpop.f32.mrf.mxu1 }
 0x162   : > { %v330_v48 = vpop.f32.mrf.mxu0 }
 0x163   : > { %v1954_v49 = vsel %vm653_vm6, 0.0, %v330_v48  ;;  %vm662_vm6 = vcmp.eq.s32.totalorder %v626_v32, %v1925_v33 }
 0x164   : > { %v1956_v51 = vpop.f32.mrf.mxu0  ;;  %807 = vmax.xlane.f32.xlu1 %v1954_v49 }
 0x165   : > { %v2068_v58 = vsel %vm656_vm2, 0.0, %v1956_v51  ;;  %v2086_v51 = vsel %vm654_vm1, 0.0, %v1945_v46  ;;  %vm679_vm1 = vcmp.eq.s32.totalorder %v643_v62, %v1925_v33 }
 0x166   : > { %v340_v54 = vpop.f32.mrf.mxu0  ;;  %v716_v6 = vmax.f32 %v1940_v41, %v2068_v58  ;;  %v646_v41 = vadd.s32 248, %v1918_v29 }
 0x167   : > { %v1965_v55 = vsel %vm655_vm7, 0.0, %v340_v54  ;;  %vm664_vm7 = vcmp.eq.s32.totalorder %v628_v34, %v1925_v33 }
 0x168   : > { %v1967_v57 = vpop.f32.mrf.mxu0  ;;  %811 = vmax.xlane.f32.xlu1 %v1965_v55 }
 0x16a   : > { %v350_v59 = vpop.f32.mrf.mxu0 }
 0x16b   : > { %v1972_v60 = vsel %vm657_vm8, 0.0, %v350_v59  ;;  %vm666_vm8 = vcmp.eq.s32.totalorder %v630_v36, %v1925_v33  ;;  %v2073_v59 = vsel %vm658_vm4, 0.0, %v1967_v57  ;;  %vm682_vm4 = vcmp.eq.s32.totalorder %v646_v41, %v1925_v33 }
 0x16c   : > { %v1974_v61 = vpop.f32.mrf.mxu0  ;;  %815 = vmax.xlane.f32.xlu1 %v1972_v60  ;;  %v717_v46 = vmax.f32 %v1954_v49, %v1972_v60 }
 0x16d   : > { %v2091_v57 = vsel %vm660_vm5, 0.0, %v1974_v61 }
 0x16e   : > { %v360_v63 = vpop.f32.mrf.mxu0  ;;  %v720_v49 = vmax.f32 %v716_v6, %v2091_v57 }
 0x16f   : > { %v1979_v0 = vsel %vm659_vm9, 0.0, %v360_v63  ;;  %vm668_vm9 = vcmp.eq.s32.totalorder %v632_v37, %v1925_v33  ;;  %v715_v63 = vmax.f32 %v1943_v43, %v1965_v55 }
 0x170   : > { %v1981_v1 = vpop.f32.mrf.mxu0  ;;  %819 = vmax.xlane.f32.xlu1 %v1979_v0 }
 0x171   : > { %v2096_v43 = vsel %vm662_vm6, 0.0, %v1981_v1  ;;  %v719_v12 = vmax.f32 %v715_v63, %v1979_v0  ;;  %vm756_vm6 = vcmask 1040384  }
 0x172   : > { %v370_v3 = vpop.f32.mrf.mxu0 }
 0x173   : > { %v1986_v4 = vsel %vm661_vm10, 0.0, %v370_v3  ;;  %vm670_vm10 = vcmp.eq.s32.totalorder %v634_v38, %v1925_v33  ;;  %v644_v3 = vadd.s32 232, %v1918_v29 }
 0x174   : > { %v1988_v5 = vpop.f32.mrf.mxu0  ;;  %823 = vmax.xlane.f32.xlu1 %v1986_v4  ;;  %v721_v0 = vmax.f32 %v717_v46, %v1986_v4  ;;  %v753_v46 = vsub.f32 0.2, %v1963_v53  ;;  %v771_v53 = vld [vmem:[#allocation2] sm:$0xff] }
 0x175   : > { %v2108_v61 = vsel %vm664_vm7, 0.0, %v1988_v5  ;;  %vm680_vm2 = vcmp.eq.s32.totalorder %v644_v3, %v1925_v33  ;;  %vm769_vm7 = vcmask 0  }
 0x176   : > { %v380_v7 = vpop.f32.mrf.mxu0  ;;  %v724_v4 = vmax.f32 %v720_v49, %v2108_v61 }
 0x177   : > { %v1993_v8 = vsel %vm663_vm11, 0.0, %v380_v7  ;;  %vm672_vm11 = vcmp.eq.s32.totalorder %v2033_v40, %v1925_v33  ;;  %v718_v7 = vmax.f32 %v2086_v51, %v2073_v59 }
 0x178   : > { %v1995_v10 = vpop.f32.mrf.mxu0  ;;  %827 = vmax.xlane.f32.xlu1 %v1993_v8  ;;  %v723_v18 = vmax.f32 %v719_v12, %v1993_v8 }
 0x179   : > { %v2113_v1 = vsel %vm666_vm8, 0.0, %v1995_v10  ;;  %v722_v60 = vmax.f32 %v718_v7, %v2096_v43 }
 0x17a   : > { %v390_v13 = vpop.f32.mrf.mxu0 }
 0x17b   : > { %v2000_v15 = vsel %vm665_vm12, 0.0, %v390_v13  ;;  %vm674_vm12 = vcmp.eq.s32.totalorder %v2038_v44, %v1925_v33  ;;  %v726_v8 = vmax.f32 %v722_v60, %v2113_v1 }
 0x17c   : > { %v2002_v16 = vpop.f32.mrf.mxu0  ;;  %831 = vmax.xlane.f32.xlu1 %v2000_v15  ;;  %v725_v26 = vmax.f32 %v721_v0, %v2000_v15 }
 0x17d   : > { %v2124_v5 = vsel %vm668_vm9, 0.0, %v2002_v16 }
 0x17e   : > { %v400_v19 = vpop.f32.mrf.mxu0  ;;  %v728_v15 = vmax.f32 %v724_v4, %v2124_v5  ;;  %v781_v4 = vld [vmem:[#allocation2 + $0x50] sm:$0xff] }
 0x17f   : > { %v2007_v20 = vsel %vm667_vm13, 0.0, %v400_v19  ;;  %vm675_vm13 = vcmp.eq.s32.totalorder %v639_v45, %v1925_v33 }
 0x180   : > { %v2009_v21 = vpop.f32.mrf.mxu0  ;;  %835 = vmax.xlane.f32.xlu1 %v2007_v20  ;;  %v727_v27 = vmax.f32 %v723_v18, %v2007_v20  ;;  %v777_v18 = vld [vmem:[#allocation2 + $0x30] sm:$0xff] }
 0x181   : > { %v2129_v10 = vsel %vm670_vm10, 0.0, %v2009_v21 }
 0x182   : > { %v410_v23 = vpop.f32.mrf.mxu0  ;;  %v730_v20 = vmax.f32 %v726_v8, %v2129_v10 }
 0x183   : > { %v2014_v24 = vsel %vm669_vm14, 0.0, %v410_v23  ;;  %vm676_vm14 = vcmp.eq.s32.totalorder %v2047_v47, %v1925_v33  ;;  %v645_v23 = vadd.s32 240, %v1918_v29 }
 0x184   : > { %v2016_v25 = vpop.f32.mrf.mxu0  ;;  %839 = vmax.xlane.f32.xlu1 %v2014_v24  ;;  %v729_v28 = vmax.f32 %v725_v26, %v2014_v24 }
 0x185   : > { %v704_v21 = vsel %vm672_vm11, 0.0, %v2016_v25  ;;  %vm681_vm5 = vcmp.eq.s32.totalorder %v645_v23, %v1925_v33 }
 0x186   : > { %v420_v35 = vpop.f32.mrf.mxu0 }
 0x187   : > { %v2030_v39 = vsel %vm671_vm15, 0.0, %v420_v35  ;;  %vm678_vm15 = vcmp.eq.s32.totalorder %v642_v50, %v1925_v33  ;;  %v732_v35 = vmax.f32 %v728_v15, %v704_v21  ;;  %v787_v15 = vld [vmem:[#allocation2 + $0x80] sm:$0xff] }
 0x188   : > { %v2035_v42 = vpop.f32.mrf.mxu0  ;;  %843 = vmax.xlane.f32.xlu1 %v2030_v39  ;;  %v731_v30 = vmax.f32 %v727_v27, %v2030_v39  ;;  %v783_v27 = vld [vmem:[#allocation2 + $0x60] sm:$0xff] }
 0x189   : > { %v706_v29 = vsel %vm674_vm12, 0.0, %v2035_v42 }
 0x18a   : > { %v430_v48 = vpop.f32.mrf.mxu0  ;;  %v734_v36 = vmax.f32 %v730_v20, %v706_v29 }
 0x18b   : > { %v2056_v54 = vsel %vm673_vm0, 0.0, %v430_v48  ;;  %vm677_vm0 = vcmp.eq.s32.totalorder %v641_v52, %v1925_v33 }
 0x18c   : > { %v1413_v56 = vpop.f32.mrf.mxu0  ;;  %847 = vmax.xlane.f32.xlu1 %v2056_v54  ;;  %v733_v37 = vmax.f32 %v729_v28, %v2056_v54 }
 0x18d   : > { %v708_v25 = vsel %vm676_vm14, 0.0, %v1413_v56 }
 0x18e   : > { %v440_v2 = vpop.f32.mrf.mxu0  ;;  %v736_v42 = vmax.f32 %v732_v35, %v708_v25 }
 0x18f   : > { %v707_v55 = vsel %vm675_vm13, 0.0, %v440_v2 }
 0x190   : > { %v1416_v13 = vpop.f32.mrf.mxu0  ;;  %851 = vmax.xlane.f32.xlu1 %v707_v55  ;;  %v735_v24 = vmax.f32 %v731_v30, %v707_v55  ;;  %v789_v30 = vld [vmem:[#allocation2 + $0x90] sm:$0xff] }
 0x191   : > { %v710_v32 = vsel %vm678_vm15, 0.0, %v1416_v13 }
 0x192   : > { %v450_v19 = vpop.f32.mrf.mxu0  ;;  %v738_v44 = vmax.f32 %v734_v36, %v710_v32  ;;  %v793_v36 = vld [vmem:[#allocation2 + $0xb0] sm:$0xff] }
 0x193   : > { %v709_v22 = vsel %vm677_vm0, 0.0, %v450_v19 }
 0x194   : > { %v1419_v16 = vpop.f32.mrf.mxu0  ;;  %855 = vmax.xlane.f32.xlu1 %v709_v22  ;;  %v737_v45 = vmax.f32 %v733_v37, %v709_v22 }
 0x195   : > { %v712_v39 = vsel %vm680_vm2, 0.0, %v1419_v16 }
 0x196   : > { %v460_v31 = vpop.f32.mrf.mxu0  ;;  %v740_v52 = vmax.f32 %v736_v42, %v712_v39  ;;  %v797_v42 = vld [vmem:[#allocation2 + $0xd0] sm:$0xff] }
 0x197   : > { %v711_v34 = vsel %vm679_vm1, 0.0, %v460_v31 }
 0x198   : > { %v1422_v38 = vpop.f32.mrf.mxu0  ;;  %859 = vmax.xlane.f32.xlu1 %v711_v34  ;;  %v739_v47 = vmax.f32 %v735_v24, %v711_v34 }
 0x199   : > { %v714_v40 = vsel %vm682_vm4, 0.0, %v1422_v38  ;;  %v795_v38 = vld [vmem:[#allocation2 + $0xc0] sm:$0xff] }
 0x19a   : > { %v470_v48 = vpop.f32.mrf.mxu0  ;;  %v742_v56 = vmax.f32 %v738_v44, %v714_v40  ;;  %v743_v54 = vmax.f32 %v739_v47, %v740_v52  ;;  %v799_v47 = vld [vmem:[#allocation2 + $0xe0] sm:$0xff]  ;;  %v801_v52 = vld [vmem:[#allocation2 + $0xf0] sm:$0xff] }
 0x19b   : > { %v713_v50 = vsel %vm681_vm5, 0.0, %v470_v48 }
 0x19c   : > { %v741_v62 = vmax.f32 %v737_v45, %v713_v50  ;;  %863 = vmax.xlane.f32.xlu1 %v713_v50 }
 0x19e   : > { %v744_v63 = vmax.f32 %v741_v62, %v742_v56 }
 0x1a0   : > { %v745_v2 = vmax.f32 %v743_v54, %v744_v63  ;;  %536 = vadd.xlane.f32.xlu1 %v1853_v17 }
 0x1a2   : > { %v746_v3 = vrot.slane %v745_v2, 4 }
 0x1a4   : > { %v747_v55 = vmax.f32 %v745_v2, %v746_v3  ;;  %540 = vadd.xlane.f32.xlu1 %v1841_v11  ;;  %v772_v11 = vld [vmem:[#allocation2 + $0x8] sm:$0xff] }
 0x1a6   : > { %v748_v33 = vrot.slane %v747_v55, 2 }
 0x1a8   : > { %v749_v6 = vmax.f32 %v747_v55, %v748_v33  ;;  %v774_v55 = vld [vmem:[#allocation2 + $0x18] sm:$0xff] }
 0x1aa   : > { %v750_v7 = vrot.slane %v749_v6, 1 }
 0x1ac   : > { %v751_v12 = vmax.f32 %v749_v6, %v750_v7 }
 0x1ae   : > { %v754_v13 = vadd.f32 %v753_v46, %v751_v12  ;;  %v776_v12 = vld [vmem:[#allocation2 + $0x28] sm:$0xff] }
 0x1b0   : > { %v755_v41 = vmax.f32 %v754_v13, 0.0 }
 0x1b2   : > { %v757_v49 = vsel %vm756_vm6, %v755_v41, 0.0 }
 0x1b3   : > { %758 = vadd.xlane.f32.xlu0 %v757_v49 }
 0x1b7   : > { %809 = vmax.xlane.f32.xlu0 %v2086_v51 }
 0x1bb   : > { %813 = vmax.xlane.f32.xlu0 %v2068_v58 }
 0x1bf   : > { %817 = vmax.xlane.f32.xlu0 %v2073_v59 }
 0x1c3   : > { %821 = vmax.xlane.f32.xlu0 %v2091_v57  ;;  %v773_v57 = vld [vmem:[#allocation2 + $0x10] sm:$0xff] }
 0x1c7   : > { %825 = vmax.xlane.f32.xlu0 %v2096_v43 }
 0x1cb   : > { %829 = vmax.xlane.f32.xlu0 %v2108_v61 }
 0x1cf   : > { %833 = vmax.xlane.f32.xlu0 %v2113_v1  ;;  %v775_v1 = vld [vmem:[#allocation2 + $0x20] sm:$0xff] }
 0x1d3   : > { %837 = vmax.xlane.f32.xlu0 %v2124_v5 }
 0x1d7   : > { %841 = vmax.xlane.f32.xlu0 %v2129_v10  ;;  %v779_v10 = vld [vmem:[#allocation2 + $0x40] sm:$0xff] }
 0x1db   : > { %845 = vmax.xlane.f32.xlu0 %v704_v21  ;;  %v785_v21 = vld [vmem:[#allocation2 + $0x70] sm:$0xff] }
 0x1df   : > { %849 = vmax.xlane.f32.xlu0 %v706_v29 }
 0x1e3   : > { %853 = vmax.xlane.f32.xlu0 %v708_v25 }
 0x1e7   : > { %v806_v17 = vpop.xlane.xlu0 %805  ;;  %857 = vmax.xlane.f32.xlu0 %v710_v32  ;;  %v791_v32 = vld [vmem:[#allocation2 + $0xa0] sm:$0xff] }
 0x1e8   : > { %v868_v58 = vmax.f32 %v772_v11, %v806_v17  ;;  %v778_v17 = vld [vmem:[#allocation2 + $0x38] sm:$0xff] }
 0x1e9   : > { %v804_v59 = vpop.xlane.xlu1 %803 }
 0x1ea   : > { %901 = vst.msk [vmem:[#allocation2 + $0x8] sm:$0xff] %vm899_vm3, %v868_v58  ;;  %v867_v51 = vmax.f32 %v771_v53, %v804_v59 }
 0x1eb   : > { %861 = vmax.xlane.f32.xlu0 %v712_v39 }
 0x1ec   : > { %900 = vst.msk [vmem:[#allocation2] sm:$0xff] %vm899_vm3, %v867_v51  ;;  %v780_v51 = vld [vmem:[#allocation2 + $0x48] sm:$0xff] }
 0x1ed   : > { %v808_v43 = vpop.xlane.xlu1 %807 }
 0x1ee   : > { %v869_v61 = vmax.f32 %v773_v57, %v808_v43 }
 0x1ef   : > { %865 = vmax.xlane.f32.xlu0 %v714_v40 }
 0x1f0   : > { %902 = vst.msk [vmem:[#allocation2 + $0x10] sm:$0xff] %vm899_vm3, %v869_v61  ;;  %v782_v61 = vld [vmem:[#allocation2 + $0x58] sm:$0xff] }
 0x1f1   : > { %v812_v60 = vpop.xlane.xlu1 %811 }
 0x1f2   : > { %v871_v0 = vmax.f32 %v775_v1, %v812_v60 }
 0x1f3   : > { %538 = vadd.xlane.f32.xlu0 %v1847_v14 }
 0x1f4   : > { %904 = vst.msk [vmem:[#allocation2 + $0x20] sm:$0xff] %vm899_vm3, %v871_v0  ;;  %v784_v0 = vld [vmem:[#allocation2 + $0x68] sm:$0xff] }
 0x1f5   : > { %v816_v19 = vpop.xlane.xlu1 %815 }
 0x1f6   : > { %v873_v5 = vmax.f32 %v777_v18, %v816_v19 }
 0x1f7   : > { %542 = vadd.xlane.f32.xlu0 %v1837_v9 }
 0x1f8   : > { %906 = vst.msk [vmem:[#allocation2 + $0x30] sm:$0xff] %vm899_vm3, %v873_v5  ;;  %v786_v5 = vld [vmem:[#allocation2 + $0x78] sm:$0xff] }
 0x1f9   : > { %v820_v22 = vpop.xlane.xlu1 %819 }
 0x1fa   : > { %v875_v23 = vmax.f32 %v779_v10, %v820_v22 }
 0x1fc   : > { %908 = vst.msk [vmem:[#allocation2 + $0x40] sm:$0xff] %vm899_vm3, %v875_v23  ;;  %v788_v23 = vld [vmem:[#allocation2 + $0x88] sm:$0xff] }
 0x1fd   : > { %v824_v8 = vpop.xlane.xlu1 %823 }
 0x1fe   : > { %v877_v26 = vmax.f32 %v781_v4, %v824_v8 }
 0x200   : > { %910 = vst.msk [vmem:[#allocation2 + $0x50] sm:$0xff] %vm899_vm3, %v877_v26  ;;  %v790_v26 = vld [vmem:[#allocation2 + $0x98] sm:$0xff] }
 0x201   : > { %v828_v14 = vpop.xlane.xlu1 %827 }
 0x202   : > { %v879_v16 = vmax.f32 %v783_v27, %v828_v14 }
 0x204   : > { %912 = vst.msk [vmem:[#allocation2 + $0x60] sm:$0xff] %vm899_vm3, %v879_v16  ;;  %v792_v16 = vld [vmem:[#allocation2 + $0xa8] sm:$0xff] }
 0x205   : > { %v832_v29 = vpop.xlane.xlu1 %831 }
 0x206   : > { %v881_v9 = vmax.f32 %v785_v21, %v832_v29 }
 0x208   : > { %914 = vst.msk [vmem:[#allocation2 + $0x70] sm:$0xff] %vm899_vm3, %v881_v9  ;;  %v794_v9 = vld [vmem:[#allocation2 + $0xb8] sm:$0xff] }
 0x209   : > { %v836_v20 = vpop.xlane.xlu1 %835 }
 0x20a   : > { %v883_v28 = vmax.f32 %v787_v15, %v836_v20 }
 0x20c   : > { %916 = vst.msk [vmem:[#allocation2 + $0x80] sm:$0xff] %vm899_vm3, %v883_v28  ;;  %v796_v28 = vld [vmem:[#allocation2 + $0xc8] sm:$0xff] }
 0x20d   : > { %v840_v31 = vpop.xlane.xlu1 %839 }
 0x20e   : > { %v885_v25 = vmax.f32 %v789_v30, %v840_v31 }
 0x210   : > { %918 = vst.msk [vmem:[#allocation2 + $0x90] sm:$0xff] %vm899_vm3, %v885_v25  ;;  %v798_v25 = vld [vmem:[#allocation2 + $0xd8] sm:$0xff] }
 0x211   : > { %v844_v34 = vpop.xlane.xlu1 %843 }
 0x212   : > { %v887_v35 = vmax.f32 %v791_v32, %v844_v34 }
 0x214   : > { %920 = vst.msk [vmem:[#allocation2 + $0xa0] sm:$0xff] %vm899_vm3, %v887_v35  ;;  %v800_v35 = vld [vmem:[#allocation2 + $0xe8] sm:$0xff] }
 0x215   : > { %v848_v37 = vpop.xlane.xlu1 %847 }
 0x216   : > { %v889_v24 = vmax.f32 %v793_v36, %v848_v37 }
 0x218   : > { %922 = vst.msk [vmem:[#allocation2 + $0xb0] sm:$0xff] %vm899_vm3, %v889_v24  ;;  %v802_v24 = vld [vmem:[#allocation2 + $0xf8] sm:$0xff] }
 0x219   : > { %v852_v39 = vpop.xlane.xlu1 %851 }
 0x21a   : > { %v891_v40 = vmax.f32 %v795_v38, %v852_v39 }
 0x21c   : > { %924 = vst.msk [vmem:[#allocation2 + $0xc0] sm:$0xff] %vm899_vm3, %v891_v40  ;;  %v752_v40 = vld [vmem:[#allocation9] sm:$0x1] }
 0x21d   : > { %v856_v44 = vpop.xlane.xlu1 %855 }
 0x21e   : > { %v893_v45 = vmax.f32 %v797_v42, %v856_v44 }
 0x220   : > { %926 = vst.msk [vmem:[#allocation2 + $0xd0] sm:$0xff] %vm899_vm3, %v893_v45 }
 0x221   : > { %v860_v48 = vpop.xlane.xlu1 %859 }
 0x222   : > { %v895_v50 = vmax.f32 %v799_v47, %v860_v48 }
 0x224   : > { %928 = vst.msk [vmem:[#allocation2 + $0xe0] sm:$0xff] %vm899_vm3, %v895_v50 }
 0x225   : > { %v864_v56 = vpop.xlane.xlu1 %863 }
 0x226   : > { %v897_v62 = vmax.f32 %v801_v52, %v864_v56 }
 0x228   : > { %930 = vst.msk [vmem:[#allocation2 + $0xf0] sm:$0xff] %vm899_vm3, %v897_v62 }
 0x229   : > { %v537_v54 = vpop.xlane.xlu1 %536 }
 0x22a   : > { %945 = vst.msk [vmem:[%s1910_s23 + $0x60] sm:$0xff] %vm899_vm3, %v537_v54 }
 0x22d   : > { %v541_v63 = vpop.xlane.xlu1 %540 }
 0x22e   : > { %947 = vst.msk [vmem:[%s1910_s23 + $0x70] sm:$0xff] %vm899_vm3, %v541_v63 }
 0x23c   : > { %v759_v2 = vpop.xlane.xlu0 %758 }
 0x23d   : > { %v760_v3 = vrot.slane %v759_v2, 4 }
 0x23f   : > { %v761_v33 = vadd.f32 %v760_v3, %v759_v2 }
 0x240   : > { %v810_v6 = vpop.xlane.xlu0 %809 }
 0x241   : > { %v762_v7 = vrot.slane %v761_v33, 2  ;;  %v870_v46 = vmax.f32 %v774_v55, %v810_v6 }
 0x243   : > { %903 = vst.msk [vmem:[#allocation2 + $0x18] sm:$0xff] %vm899_vm3, %v870_v46  ;;  %v763_v13 = vadd.f32 %v762_v7, %v761_v33 }
 0x244   : > { %v814_v41 = vpop.xlane.xlu0 %813 }
 0x245   : > { %v872_v49 = vmax.f32 %v776_v12, %v814_v41  ;;  %v764_v11 = vrot.slane %v763_v13, 1 }
 0x247   : > { %905 = vst.msk [vmem:[#allocation2 + $0x28] sm:$0xff] %vm899_vm3, %v872_v49  ;;  %v765_v53 = vadd.f32 %v764_v11, %v763_v13 }
 0x248   : > { %v818_v58 = vpop.xlane.xlu0 %817 }
 0x249   : > { %v874_v59 = vmax.f32 %v778_v17, %v818_v58  ;;  %1458 = vpush %v765_v53 }
 0x24b   : > { %907 = vst.msk [vmem:[#allocation2 + $0x38] sm:$0xff] %vm899_vm3, %v874_v59 }
 0x24c   : > { %v822_v57 = vpop.xlane.xlu0 %821 }
 0x24d   : > { %v876_v43 = vmax.f32 %v780_v51, %v822_v57 }
 0x24f   : > { %909 = vst.msk [vmem:[#allocation2 + $0x48] sm:$0xff] %vm899_vm3, %v876_v43 }
 0x250   : > { %v826_v1 = vpop.xlane.xlu0 %825 }
 0x251   : > { %v878_v60 = vmax.f32 %v782_v61, %v826_v1 }
 0x253   : > { %911 = vst.msk [vmem:[#allocation2 + $0x58] sm:$0xff] %vm899_vm3, %v878_v60 }
 0x254   : > { %v830_v18 = vpop.xlane.xlu0 %829 }
 0x255   : > { %v880_v19 = vmax.f32 %v784_v0, %v830_v18 }
 0x257   : > { %913 = vst.msk [vmem:[#allocation2 + $0x68] sm:$0xff] %vm899_vm3, %v880_v19 }
 0x258   : > { %v834_v10 = vpop.xlane.xlu0 %833 }
 0x259   : > { %v882_v22 = vmax.f32 %v786_v5, %v834_v10 }
 0x25b   : > { %915 = vst.msk [vmem:[#allocation2 + $0x78] sm:$0xff] %vm899_vm3, %v882_v22 }
 0x25c   : > { %v838_v4 = vpop.xlane.xlu0 %837 }
 0x25d   : > { %v884_v8 = vmax.f32 %v788_v23, %v838_v4 }
 0x25f   : > { %917 = vst.msk [vmem:[#allocation2 + $0x88] sm:$0xff] %vm899_vm3, %v884_v8 }
 0x260   : > { %v842_v27 = vpop.xlane.xlu0 %841 }
 0x261   : > { %v886_v14 = vmax.f32 %v790_v26, %v842_v27 }
 0x263   : > { %919 = vst.msk [vmem:[#allocation2 + $0x98] sm:$0xff] %vm899_vm3, %v886_v14 }
 0x264   : > { %v846_v21 = vpop.xlane.xlu0 %845 }
 0x265   : > { %v888_v29 = vmax.f32 %v792_v16, %v846_v21 }
 0x267   : > { %921 = vst.msk [vmem:[#allocation2 + $0xa8] sm:$0xff] %vm899_vm3, %v888_v29 }
 0x268   : > { %v850_v15 = vpop.xlane.xlu0 %849 }
 0x269   : > { %v890_v20 = vmax.f32 %v794_v9, %v850_v15 }
 0x26b   : > { %923 = vst.msk [vmem:[#allocation2 + $0xb8] sm:$0xff] %vm899_vm3, %v890_v20 }
 0x26c   : > { %v854_v30 = vpop.xlane.xlu0 %853 }
 0x26d   : > { %v892_v31 = vmax.f32 %v796_v28, %v854_v30 }
 0x26f   : > { %925 = vst.msk [vmem:[#allocation2 + $0xc8] sm:$0xff] %vm899_vm3, %v892_v31 }
 0x270   : > { %v858_v32 = vpop.xlane.xlu0 %857 }
 0x271   : > { %v894_v34 = vmax.f32 %v798_v25, %v858_v32 }
 0x273   : > { %927 = vst.msk [vmem:[#allocation2 + $0xd8] sm:$0xff] %vm899_vm3, %v894_v34 }
 0x274   : > { %v862_v36 = vpop.xlane.xlu0 %861 }
 0x275   : > { %v896_v37 = vmax.f32 %v800_v35, %v862_v36 }
 0x277   : > { %929 = vst.msk [vmem:[#allocation2 + $0xe8] sm:$0xff] %vm899_vm3, %v896_v37 }
 0x278   : > { %v866_v38 = vpop.xlane.xlu0 %865 }
 0x279   : > { %v898_v39 = vmax.f32 %v802_v24, %v866_v38 }
 0x27a   : > { %s1459_s24 = spop %1458 }
 0x27b   : > { %931 = vst.msk [vmem:[#allocation2 + $0xf8] sm:$0xff] %vm899_vm3, %v898_v39  ;;  %v767_v42 = vstv %s1459_s24 }
 0x27c   : > { %v768_v44 = vadd.f32 %v767_v42, %v752_v40  ;;  %v539_v45 = vpop.xlane.xlu0 %538 }
 0x27d   : > { %946 = vst.msk [vmem:[%s1910_s23 + $0x68] sm:$0xff] %vm899_vm3, %v539_v45  ;;  %952 = sbr.rel (%p1272_p0) target bundleno = 922 (0x39a), region = 44 }
 0x27e   : > { %770 = vst.msk [vmem:[#allocation9] sm:$0x1] %vm769_vm7, %v768_v44 }
 0x280   : > { %v543_v47 = vpop.xlane.xlu0 %542 }
 0x281   : > { %948 = vst.msk [vmem:[%s1910_s23 + $0x78] sm:$0xff] %vm899_vm3, %v543_v47 }
 0x282   : > { %v953_v56 = vld [vmem:[#allocation2] sm:$0xff]  ;;  %v954_v3 = vld [vmem:[#allocation2 + $0x8] sm:$0xff]  ;;  %v955_v55 = vld [vmem:[#allocation2 + $0x10] sm:$0xff] }
 0x283   : > { %v956_v7 = vld [vmem:[#allocation2 + $0x18] sm:$0xff]  ;;  %v957_v17 = vld [vmem:[#allocation2 + $0x20] sm:$0xff]  ;;  %v958_v59 = vld [vmem:[#allocation2 + $0x28] sm:$0xff] }
 0x284   : > { %v959_v43 = vld [vmem:[#allocation2 + $0x30] sm:$0xff]  ;;  %v960_v22 = vld [vmem:[#allocation2 + $0x38] sm:$0xff]  ;;  %v961_v21 = vld [vmem:[#allocation2 + $0x40] sm:$0xff] }
 0x285   : > { %v962_v31 = vld [vmem:[#allocation2 + $0x48] sm:$0xff]  ;;  %v963_v24 = vld [vmem:[#allocation2 + $0x50] sm:$0xff]  ;;  %v964_v47 = vld [vmem:[#allocation2 + $0x58] sm:$0xff] }
 0x288   : > { %v985_v48 = vld [vmem:[#allocation3] sm:$0xff]  ;;  %v986_v50 = vld [vmem:[#allocation3 + $0x8] sm:$0xff]  ;;  %v987_v52 = vld [vmem:[#allocation3 + $0x10] sm:$0xff] }
 0x289   : > { %v988_v62 = vld [vmem:[#allocation3 + $0x18] sm:$0xff]  ;;  %v1017_v54 = vsub.f32 0.2, %v985_v48  ;;  %v1018_v63 = vsub.f32 0.2, %v986_v50  ;;  %v989_v33 = vld [vmem:[#allocation3 + $0x20] sm:$0xff] }
 0x28a   : > { %v1019_v2 = vsub.f32 0.2, %v987_v52  ;;  %v1020_v6 = vsub.f32 0.2, %v988_v62  ;;  %v990_v46 = vld [vmem:[#allocation3 + $0x28] sm:$0xff]  ;;  %v991_v12 = vld [vmem:[#allocation3 + $0x30] sm:$0xff] }
 0x28b   : > { %v1021_v13 = vsub.f32 0.2, %v989_v33  ;;  %v1049_v41 = vadd.f32 %v1017_v54, %v953_v56  ;;  %v1050_v49 = vadd.f32 %v1018_v63, %v954_v3  ;;  %v1022_v53 = vsub.f32 0.2, %v990_v46  ;;  %v992_v51 = vld [vmem:[#allocation3 + $0x38] sm:$0xff]  ;;  %v993_v61 = vld [vmem:[#allocation3 + $0x40] sm:$0xff] }
 0x28c   : > { %v1051_v11 = vadd.f32 %v1019_v2, %v955_v55  ;;  %v1052_v58 = vadd.f32 %v1020_v6, %v956_v7  ;;  %v1023_v57 = vsub.f32 0.2, %v991_v12  ;;  %v1024_v19 = vsub.f32 0.2, %v992_v51  ;;  %v994_v23 = vld [vmem:[#allocation3 + $0x48] sm:$0xff]  ;;  %v995_v29 = vld [vmem:[#allocation3 + $0x50] sm:$0xff] }
 0x28d   : > { %v1053_v1 = vadd.f32 %v1021_v13, %v957_v17  ;;  %v1081_v60 = vmax.f32 %v1049_v41, 0.0  ;;  %v1082_v0 = vmax.f32 %v1050_v49, 0.0  ;;  %v1054_v5 = vadd.f32 %v1022_v53, %v958_v59  ;;  %v996_v25 = vld [vmem:[#allocation3 + $0x58] sm:$0xff]  ;;  %v997_v38 = vld [vmem:[#allocation3 + $0x60] sm:$0xff]  ;;  %v998_v48 = vld [vmem:[#allocation3 + $0x68] sm:$0xff] }
 0x28e   : > { %v1083_v18 = vmax.f32 %v1051_v11, 0.0  ;;  %v1084_v10 = vmax.f32 %v1052_v58, 0.0  ;;  %v1025_v4 = vsub.f32 0.2, %v993_v61  ;;  %v1055_v8 = vadd.f32 %v1023_v57, %v959_v43  ;;  %v965_v63 = vld [vmem:[#allocation2 + $0x60] sm:$0xff]  ;;  %v999_v2 = vld [vmem:[#allocation3 + $0x70] sm:$0xff] }
 0x28f   : > { %v1085_v26 = vmax.f32 %v1053_v1, 0.0  ;;  %v1113_v27 = vsel %vm899_vm3, %v1081_v60, 0.0  ;;  %v1114_v14 = vsel %vm899_vm3, %v1082_v0, 0.0  ;;  %v1026_v15 = vsub.f32 0.2, %v994_v23  ;;  %v966_v46 = vld [vmem:[#allocation2 + $0x68] sm:$0xff] }
 0x290   : > { %v1116_v16 = vsel %vm899_vm3, %v1083_v18, 0.0  ;;  %v1115_v9 = vadd.f32 %v1114_v14, %v1113_v27  ;;  %v1056_v20 = vadd.f32 %v1024_v19, %v960_v22  ;;  %v1086_v28 = vmax.f32 %v1054_v5, 0.0  ;;  %v1000_v12 = vld [vmem:[#allocation3 + $0x78] sm:$0xff]  ;;  %v967_v53 = vld [vmem:[#allocation2 + $0x70] sm:$0xff]  ;;  %v1001_v58 = vld [vmem:[#allocation3 + $0x80] sm:$0xff] }
 0x291   : > { %v1118_v30 = vsel %vm899_vm3, %v1084_v10, 0.0  ;;  %v1027_v34 = vsub.f32 0.2, %v995_v29  ;;  %v1057_v35 = vadd.f32 %v1025_v4, %v961_v21  ;;  %v1087_v36 = vmax.f32 %v1055_v8, 0.0  ;;  %v968_v1 = vld [vmem:[#allocation2 + $0x78] sm:$0xff]  ;;  %v1002_v60 = vld [vmem:[#allocation3 + $0x88] sm:$0xff] }
 0x292   : > { %v1117_v32 = vadd.f32 %v1116_v16, %v1115_v9  ;;  %v1120_v37 = vsel %vm899_vm3, %v1085_v26, 0.0  ;;  %v1028_v40 = vsub.f32 0.2, %v996_v25  ;;  %v1058_v42 = vadd.f32 %v1026_v15, %v962_v31  ;;  %v969_v22 = vld [vmem:[#allocation2 + $0x80] sm:$0xff]  ;;  %v1003_v23 = vld [vmem:[#allocation3 + $0x90] sm:$0xff]  ;;  %v970_v16 = vld [vmem:[#allocation2 + $0x88] sm:$0xff] }
 0x293   : > { %v1088_v44 = vmax.f32 %v1056_v20, 0.0  ;;  %v1122_v45 = vsel %vm899_vm3, %v1086_v28, 0.0  ;;  %v1029_v52 = vsub.f32 0.2, %v997_v38  ;;  %v1059_v56 = vadd.f32 %v1027_v34, %v963_v24  ;;  %v1004_v21 = vld [vmem:[#allocation3 + $0x98] sm:$0xff]  ;;  %v1005_v31 = vld [vmem:[#allocation3 + $0xa0] sm:$0xff] }
 0x294   : > { %v1119_v39 = vadd.f32 %v1118_v30, %v1117_v32  ;;  %v1089_v62 = vmax.f32 %v1057_v35, 0.0  ;;  %v1124_v54 = vsel %vm899_vm3, %v1087_v36, 0.0  ;;  %v1030_v55 = vsub.f32 0.2, %v998_v48  ;;  %v971_v30 = vld [vmem:[#allocation2 + $0x90] sm:$0xff]  ;;  %v1006_v24 = vld [vmem:[#allocation3 + $0xa8] sm:$0xff] }
 0x295   : > { %v1060_v33 = vadd.f32 %v1028_v40, %v964_v47  ;;  %v1090_v6 = vmax.f32 %v1058_v42, 0.0  ;;  %v1126_v7 = vsel %vm899_vm3, %v1088_v44, 0.0  ;;  %v1031_v41 = vsub.f32 0.2, %v999_v2  ;;  %v1007_v47 = vld [vmem:[#allocation3 + $0xb0] sm:$0xff] }
 0x296   : > { %v1121_v50 = vadd.f32 %v1120_v37, %v1119_v39  ;;  %v1061_v49 = vadd.f32 %v1029_v52, %v965_v63  ;;  %v1091_v11 = vmax.f32 %v1059_v56, 0.0  ;;  %v1128_v17 = vsel %vm899_vm3, %v1089_v62, 0.0  ;;  %v972_v37 = vld [vmem:[#allocation2 + $0x98] sm:$0xff] }
 0x297   : > { %v1032_v51 = vsub.f32 0.2, %v1000_v12  ;;  %v1062_v57 = vadd.f32 %v1030_v55, %v966_v46  ;;  %v1092_v43 = vmax.f32 %v1060_v33, 0.0  ;;  %v1130_v61 = vsel %vm899_vm3, %v1090_v6, 0.0  ;;  %v1008_v63 = vld [vmem:[#allocation3 + $0xb8] sm:$0xff]  ;;  %v1009_v46 = vld [vmem:[#allocation3 + $0xc0] sm:$0xff] }
 0x298   : > { %v1123_v3 = vadd.f32 %v1122_v45, %v1121_v50  ;;  %v1033_v18 = vsub.f32 0.2, %v1001_v58  ;;  %v1063_v19 = vadd.f32 %v1031_v41, %v967_v53  ;;  %v1093_v5 = vmax.f32 %v1061_v49, 0.0  ;;  %v973_v45 = vld [vmem:[#allocation2 + $0xa0] sm:$0xff]  ;;  %v1010_v53 = vld [vmem:[#allocation3 + $0xc8] sm:$0xff] }
 0x299   : > { %v1132_v10 = vsel %vm899_vm3, %v1091_v11, 0.0  ;;  %v1034_v8 = vsub.f32 0.2, %v1002_v60  ;;  %v1064_v26 = vadd.f32 %v1032_v51, %v968_v1  ;;  %v1094_v27 = vmax.f32 %v1062_v57, 0.0  ;;  %v1011_v1 = vld [vmem:[#allocation3 + $0xd0] sm:$0xff] }
 0x29a   : > { %v1125_v13 = vadd.f32 %v1124_v54, %v1123_v3  ;;  %v1134_v14 = vsel %vm899_vm3, %v1092_v43, 0.0  ;;  %v1035_v9 = vsub.f32 0.2, %v1003_v23  ;;  %v1065_v15 = vadd.f32 %v1033_v18, %v969_v22  ;;  %v974_v54 = vld [vmem:[#allocation2 + $0xa8] sm:$0xff]  ;;  %v1012_v22 = vld [vmem:[#allocation3 + $0xd8] sm:$0xff] }
 0x29b   : > { %v1095_v20 = vmax.f32 %v1063_v19, 0.0  ;;  %v1136_v28 = vsel %vm899_vm3, %v1093_v5, 0.0  ;;  %v1036_v32 = vsub.f32 0.2, %v1004_v21  ;;  %v1066_v34 = vadd.f32 %v1034_v8, %v970_v16  ;;  %v1013_v16 = vld [vmem:[#allocation3 + $0xe0] sm:$0xff] }
 0x29c   : > { %v1127_v59 = vadd.f32 %v1126_v7, %v1125_v13  ;;  %v1096_v35 = vmax.f32 %v1064_v26, 0.0  ;;  %v1138_v36 = vsel %vm899_vm3, %v1094_v27, 0.0  ;;  %v1037_v39 = vsub.f32 0.2, %v1005_v31  ;;  %v975_v7 = vld [vmem:[#allocation2 + $0xb0] sm:$0xff] }
 0x29d   : > { %v1067_v40 = vadd.f32 %v1035_v9, %v971_v30  ;;  %v1097_v42 = vmax.f32 %v1065_v15, 0.0  ;;  %v1140_v44 = vsel %vm899_vm3, %v1095_v20, 0.0  ;;  %v1038_v50 = vsub.f32 0.2, %v1006_v24  ;;  %v1014_v30 = vld [vmem:[#allocation3 + $0xe8] sm:$0xff] }
 0x29e   : > { %v1129_v0 = vadd.f32 %v1128_v17, %v1127_v59  ;;  %v1068_v52 = vadd.f32 %v1036_v32, %v972_v37  ;;  %v1098_v56 = vmax.f32 %v1066_v34, 0.0  ;;  %v1142_v62 = vsel %vm899_vm3, %v1096_v35, 0.0  ;;  %v976_v17 = vld [vmem:[#allocation2 + $0xb8] sm:$0xff]  ;;  %v1015_v37 = vld [vmem:[#allocation3 + $0xf0] sm:$0xff] }
 0x29f   : > { %v1039_v3 = vsub.f32 0.2, %v1007_v47  ;;  %v1069_v55 = vadd.f32 %v1037_v39, %v973_v45  ;;  %v1099_v33 = vmax.f32 %v1067_v40, 0.0  ;;  %v1144_v6 = vsel %vm899_vm3, %v1097_v42, 0.0  ;;  %v1016_v45 = vld [vmem:[#allocation3 + $0xf8] sm:$0xff] }
 0x2a0   : > { %v1131_v4 = vadd.f32 %v1130_v61, %v1129_v0  ;;  %v1040_v13 = vsub.f32 0.2, %v1008_v63  ;;  %v1070_v41 = vadd.f32 %v1038_v50, %v974_v54  ;;  %v1100_v49 = vmax.f32 %v1068_v52, 0.0  ;;  %v977_v61 = vld [vmem:[#allocation2 + $0xc0] sm:$0xff] }
 0x2a1   : > { %v1146_v11 = vsel %vm899_vm3, %v1098_v56, 0.0  ;;  %v1041_v59 = vsub.f32 0.2, %v1009_v46  ;;  %v1071_v51 = vadd.f32 %v1039_v3, %v975_v7  ;;  %v1101_v57 = vmax.f32 %v1069_v55, 0.0 }
 0x2a2   : > { %v1133_v29 = vadd.f32 %v1132_v10, %v1131_v4  ;;  %v1148_v43 = vsel %vm899_vm3, %v1099_v33, 0.0  ;;  %v1042_v0 = vsub.f32 0.2, %v1010_v53  ;;  %v1072_v18 = vadd.f32 %v1040_v13, %v976_v17  ;;  %v978_v10 = vld [vmem:[#allocation2 + $0xc8] sm:$0xff]  ;;  %v984_v33 = vld [vmem:[#allocation2 + $0xf8] sm:$0xff] }
 0x2a3   : > { %v1102_v19 = vmax.f32 %v1070_v41, 0.0  ;;  %v1150_v5 = vsel %vm899_vm3, %v1100_v49, 0.0  ;;  %v1043_v4 = vsub.f32 0.2, %v1011_v1  ;;  %v1073_v8 = vadd.f32 %v1041_v59, %v977_v61 }
 0x2a4   : > { %v1135_v25 = vadd.f32 %v1134_v14, %v1133_v29  ;;  %v1103_v26 = vmax.f32 %v1071_v51, 0.0  ;;  %v1152_v27 = vsel %vm899_vm3, %v1101_v57, 0.0  ;;  %v979_v14 = vld [vmem:[#allocation2 + $0xd0] sm:$0xff]  ;;  %v1044_v29 = vsub.f32 0.2, %v1012_v22 }
 0x2a5   : > { %v1074_v9 = vadd.f32 %v1042_v0, %v978_v10  ;;  %v1104_v15 = vmax.f32 %v1072_v18, 0.0  ;;  %v1154_v20 = vsel %vm899_vm3, %v1102_v19, 0.0  ;;  %v1075_v32 = vadd.f32 %v1043_v4, %v979_v14 }
 0x2a6   : > { %v1137_v38 = vadd.f32 %v1136_v28, %v1135_v25  ;;  %v980_v28 = vld [vmem:[#allocation2 + $0xd8] sm:$0xff]  ;;  %v1045_v25 = vsub.f32 0.2, %v1013_v16  ;;  %v1105_v34 = vmax.f32 %v1073_v8, 0.0  ;;  %v1156_v35 = vsel %vm899_vm3, %v1103_v26, 0.0 }
 0x2a7   : > { %v1076_v39 = vadd.f32 %v1044_v29, %v980_v28  ;;  %v1106_v40 = vmax.f32 %v1074_v9, 0.0  ;;  %v1158_v42 = vsel %vm899_vm3, %v1104_v15, 0.0  ;;  %v1107_v52 = vmax.f32 %v1075_v32, 0.0  ;;  %v1185_v26 = vld [vmem:[#allocation9] sm:$0x1] }
 0x2a8   : > { %v1139_v48 = vadd.f32 %v1138_v36, %v1137_v38  ;;  %v981_v36 = vld [vmem:[#allocation2 + $0xe0] sm:$0xff]  ;;  %v1046_v38 = vsub.f32 0.2, %v1014_v30  ;;  %v1160_v56 = vsel %vm899_vm3, %v1105_v34, 0.0  ;;  %v1048_v63 = vsub.f32 0.2, %v1016_v45 }
 0x2a9   : > { %v1077_v50 = vadd.f32 %v1045_v25, %v981_v36  ;;  %v1108_v3 = vmax.f32 %v1076_v39, 0.0  ;;  %v1162_v55 = vsel %vm899_vm3, %v1106_v40, 0.0 }
 0x2aa   : > { %v1141_v2 = vadd.f32 %v1140_v44, %v1139_v48  ;;  %v982_v44 = vld [vmem:[#allocation2 + $0xe8] sm:$0xff]  ;;  %v1047_v48 = vsub.f32 0.2, %v1015_v37  ;;  %v1080_v41 = vadd.f32 %v1048_v63, %v984_v33 }
 0x2ab   : > { %v1109_v46 = vmax.f32 %v1077_v50, 0.0 }
 0x2ac   : > { %v1143_v12 = vadd.f32 %v1142_v62, %v1141_v2  ;;  %v983_v62 = vld [vmem:[#allocation2 + $0xf0] sm:$0xff]  ;;  %v1078_v2 = vadd.f32 %v1046_v38, %v982_v44  ;;  %v1112_v51 = vmax.f32 %v1080_v41, 0.0 }
 0x2ad   : > { %v1079_v7 = vadd.f32 %v1047_v48, %v983_v62 }
 0x2ae   : > { %v1145_v58 = vadd.f32 %v1144_v6, %v1143_v12  ;;  %v1164_v12 = vsel %vm899_vm3, %v1107_v52, 0.0  ;;  %v1110_v49 = vmax.f32 %v1078_v2, 0.0 }
 0x2af   : > { %v1111_v53 = vmax.f32 %v1079_v7, 0.0 }
 0x2b0   : > { %v1147_v60 = vadd.f32 %v1146_v11, %v1145_v58  ;;  %v1166_v11 = vsel %vm899_vm3, %v1108_v3, 0.0  ;;  %v1168_v58 = vsel %vm899_vm3, %v1109_v46, 0.0  ;;  %v1170_v57 = vsel %vm899_vm3, %v1110_v49, 0.0 }
 0x2b1   : > { %v1172_v61 = vsel %vm899_vm3, %v1111_v53, 0.0 }
 0x2b2   : > { %v1149_v23 = vadd.f32 %v1148_v43, %v1147_v60  ;;  %v1174_v60 = vsel %vm899_vm3, %v1112_v51, 0.0 }
 0x2b4   : > { %v1151_v21 = vadd.f32 %v1150_v5, %v1149_v23 }
 0x2b6   : > { %v1153_v31 = vadd.f32 %v1152_v27, %v1151_v21 }
 0x2b8   : > { %v1155_v24 = vadd.f32 %v1154_v20, %v1153_v31 }
 0x2ba   : > { %v1157_v47 = vadd.f32 %v1156_v35, %v1155_v24 }
 0x2bc   : > { %v1159_v54 = vadd.f32 %v1158_v42, %v1157_v47 }
 0x2be   : > { %v1161_v6 = vadd.f32 %v1160_v56, %v1159_v54 }
 0x2c0   : > { %v1163_v13 = vadd.f32 %v1162_v55, %v1161_v6 }
 0x2c2   : > { %v1165_v17 = vadd.f32 %v1164_v12, %v1163_v13 }
 0x2c4   : > { %v1167_v59 = vadd.f32 %v1166_v11, %v1165_v17 }
 0x2c6   : > { %v1169_v43 = vadd.f32 %v1168_v58, %v1167_v59 }
 0x2c8   : > { %v1171_v1 = vadd.f32 %v1170_v57, %v1169_v43 }
 0x2ca   : > { %v1173_v0 = vadd.f32 %v1172_v61, %v1171_v1 }
 0x2cc   : > { %v1175_v18 = vadd.f32 %v1174_v60, %v1173_v0 }
 0x2ce   : > { %1176 = vadd.xlane.f32.xlu0 %v1175_v18 }
 0x357   : > { %v1177_v19 = vpop.xlane.xlu0 %1176 }
 0x358   : > { %v1178_v5 = vrot.slane %v1177_v19, 4 }
 0x35a   : > { %v1179_v10 = vadd.f32 %v1178_v5, %v1177_v19 }
 0x35c   : > { %v1180_v22 = vrot.slane %v1179_v10, 2 }
 0x35e   : > { %v1181_v23 = vadd.f32 %v1180_v22, %v1179_v10 }
 0x360   : > { %v1182_v4 = vrot.slane %v1181_v23, 1 }
 0x362   : > { %v1183_v8 = vadd.f32 %v1182_v4, %v1181_v23 }
 0x364   : > { %1460 = vpush %v1183_v8 }
 0x395   : > { %s1461_s5 = spop %1460 }
 0x396   : > { %v1186_v27 = vstv %s1461_s5 }
 0x397   : > { %v1187_v14 = vadd.f32 %v1186_v27, %v1185_v26 }
 0x399   : > { %1188 = vst.msk [vmem:[#allocation9] sm:$0x1] %vm769_vm7, %v1187_v14 }
 0x39a PF: > { %p1483_p3 = scmp.eq.s32.totalorder %s1692_s13, 1  ;;  %s1657_s6 = smov [#allocation9]  }
 0x39b   : > { %s1196_s7 = sshll.u32 %s1657_s6, 4  ;;  %s1197_s7 = int_to_ptr.vmem [resolvable:$true] %s1196_s7 }
 0x39c   : > { %s1580_s8 = scalar_lea.vmem %s1197_s7, 16  ;;  %s1586_s9 = scalar_lea.vmem %s1197_s7, 32 }
 0x39d   : > { %p1581_p7 = scmp.ne.s32.totalorder %s1197_s7, %s1580_s8  ;;  %p1587_p11 = scmp.lt.s32.totalorder %s1197_s7, %s1197_s7 }
 0x39e   : > { %p1588_p12 = scmp.lt.s32.totalorder %s1586_s9, %s1580_s8 }
 0x39f   : > { %p1582_p9 = pnand %p1581_p7, %p1483_p3 }
 0x3a0   : > { %p1589_p13 = por %p1588_p12, %p1587_p11 }
 0x3a1   : > { %p1583_p10 = pneg %p1582_p9 }
 0x3a3   : > { %p1590_p2 = pnand %p1589_p13, %p1583_p10 }
 0x3a5   : > { %1593 = shalt.err (!%p1590_p2)
}
 0x3a6   : > { %1469 = dma.vmem_to_hbm [thread:$0]  (%p1483_p3), %s1197_s7, 16, %s2281_s2, [#allocation6]  }
 0x3a7   : > { %1629 = dma.done.wait (%p1483_p3), [#allocation6], 16  }
 0x3a8   : > { %1631 = vsyncadd (%p1483_p3), [#allocation6], 4294967280 }
 0x3a9 PF: > { %p14_p4 = scmp.ge.s32.totalorder %s1718_s19, 4   ;;  %s2294_s9 = smov %s1638_s10 }
 0x3aa   : > { %s2295_s10 = smov %s1642_s11  ;;  %s2296_s11 = smov %s1738_s27 }
 0x3ab   : > { %s2297_s12 = smov %s1718_s19  ;;  %16 = sbr.rel (!%p14_p4) target bundleno = 5 (0x5), region = 79 }
 0x3b0   :  { %1209 = vsyncpa [#allocation5], 1 }
 0x3b1   :  { %1211 = vsyncpa [#allocation5 + $0x1], 1 }
 0x3b2   :  { %1212 = vsyncpa [#allocation8], 1 }
 0x3b3   :  { %1213 = vsyncpa [#allocation6], 1 }
 0x3b4   :  { %1215 = vsyncpa [#allocation6 + $0x1], 1 }

</bundles_post_ra>
